<compile_context>
chip_gen: v6e
topology: v6e:2x2x1
jax: 0.10.0
libtpu: 0.0.40
codegen_flags: <defaults>
</compile_context>

<pallas_src>
import numpy as np
import jax
import jax.numpy as jnp
from jax.experimental import pallas as pl
from jax.experimental.pallas import tpu as pltpu


def _align_latent_kernel(x_ref, q_ref, w_ref, vec_ref, out_ref):
    # x_ref:   (bb, N, Q) f32   input rows for this grid step
    # q_ref:   (bb, 1, D) f32   flattened raw query tokens
    # w_ref:   (5, Q, Q)  bf16  [wqk.T, wv.T, wo.T, wf1.T, wf2.T]
    # vec_ref: (8, Q)     f32   [bqk, lnc_g, lnc_b, bo, ln2_g, ln2_b, bf1, bf2]
    # out_ref: (bb, N, Q) f32
    f32, bf16 = jnp.float32, jnp.bfloat16
    bb, n_seq, qdim = x_ref.shape
    d = w_ref.shape[1]

    def mm(a, w):                      # bf16 operands on the MXU, f32 accumulation
        return jnp.dot(a.astype(bf16), w, preferred_element_type=f32)

    def vec(i):                        # (1, Q) row of the packed bias/LN table
        return vec_ref[i:i + 1, :]

    def layernorm(v, g, b):
        mu = jnp.mean(v, axis=-1, keepdims=True)
        c = v - mu
        var = jnp.mean(c * c, axis=-1, keepdims=True)
        return c * jax.lax.rsqrt(var + 1e-5) * g + b

    def gelu(v):                       # tanh-approx GELU -> tanh uses the EUP slot
        return 0.5 * v * (1.0 + jnp.tanh(0.7978845608028654 * (v + 0.044715 * v * v * v)))

    x = x_ref[...]                                   # (bb, N, Q) f32
    qflat = q_ref[...].reshape(bb, d)                # (bb, D)

    # query_to_key: one context token per batch element.
    ctx = mm(qflat, w_ref[0]) + vec(0)               # (bb, Q)

    # Cross attention with a single context token: softmax over one key == 1, so
    # attention output == to_out(v).  to_q and the PreNorm LayerNorm on x are
    # mathematically dead and are not computed.
    cn = layernorm(ctx, vec(1), vec(2))              # norm_context
    v = mm(cn, w_ref[1])                             # (bb, D)  v half of to_kv (no bias)
    attn_row = mm(v, w_ref[2]) + vec(3)              # (bb, Q)  to_out
    x2 = x + attn_row[:, None, :]                    # residual 1 (broadcast over N)

    # PreNorm feed-forward over all bb*N rows (fills the MXU M dimension).
    x2_flat = x2.reshape(bb * n_seq, qdim)
    x2n = layernorm(x2_flat, vec(4), vec(5))
    h = gelu(mm(x2n, w_ref[3]) + vec(6))             # (bb*N, F)
    ff = mm(h, w_ref[4]) + vec(7)                    # (bb*N, Q)
    out_ref[...] = (ff + x2_flat).reshape(bb, n_seq, qdim).astype(out_ref.dtype)  # residual 2


def align_latent_forward(inp, query, params):
    """inp: (B, N, queries_dim) f32; query: (B, c1, h, w) f32 with c1*h*w == dim."""
    B, N, Q = inp.shape
    D = params["wqk"].shape[1]          # query_to_key: Linear(dim, queries_dim)
    F = params["wf1"].shape[0]          # feed-forward hidden width
    assert params["wqk"].shape[0] == Q
    assert query.shape[0] == B and int(np.prod(query.shape[1:])) == D
    # Module self-consistency (LayerNorm(dim)/to_kv(dim) applied to the queries_dim
    # projected query) plus the packed square-weight layout require Q == D == F.
    assert Q == D == F

    f32, bf16 = jnp.float32, jnp.bfloat16
    q_flat = query.reshape(B, 1, D).astype(f32)      # rearrange 'b c1 h w -> b (c1 h w)'

    # Five (Q, Q) weight matrices packed into one bf16 slab (one resident VMEM
    # buffer / one DMA).  to_q and the attention-PreNorm LayerNorm(x) are dead for a
    # single-token context and are not shipped; only the v half of to_kv is kept.
    w_pack = jnp.stack([
        params["wqk"].T,                 # query_to_key
        params["wkv"][D:, :].T,          # v half of to_kv
        params["wo"].T,                  # to_out
        params["wf1"].T,                 # ff in
        params["wf2"].T,                 # ff out
    ]).astype(bf16)                      # (5, Q, Q)

    # Eight bias / LayerNorm vectors packed into one (8, Q) f32 table.
    vecs = jnp.stack([
        params["bqk"], params["lnc_g"], params["lnc_b"], params["bo"],
        params["ln2_g"], params["ln2_b"], params["bf1"], params["bf2"],
    ]).astype(f32)                       # (8, Q)

    # Fold as many batch elements per grid step as comfortably fit VMEM so the
    # feed-forward matmuls see bb*N rows and per-step overhead is amortized.
    act_block = N * Q * 4                               # one batch element, f32
    budget = 24 * 1024 * 1024
    bb = B
    while bb > 1 and 12 * bb * act_block > budget:      # in/out double-buffered + temps
        bb -= 1
        while B % bb:
            bb -= 1
    steps = B // bb

    vmem_limit = 2 * (5 * Q * Q * 2 + 8 * Q * 4 + bb * D * 4) \
        + 12 * bb * act_block + (4 << 20)
    vmem_limit = int(min(max(vmem_limit, 8 << 20), 32 << 20))

    return pl.pallas_call(
        _align_latent_kernel,
        out_shape=jax.ShapeDtypeStruct((B, N, Q), jnp.float32),
        grid=(steps,),
        in_specs=[
            pl.BlockSpec((bb, N, Q), lambda b: (b, 0, 0)),     # bb batch elems / step
            pl.BlockSpec((bb, 1, D), lambda b: (b, 0, 0)),     # their flattened queries
            pl.BlockSpec((5, Q, Q), lambda b: (0, 0, 0)),      # resident packed weights
            pl.BlockSpec((8, Q), lambda b: (0, 0)),            # resident packed vectors
        ],
        out_specs=pl.BlockSpec((bb, N, Q), lambda b: (b, 0, 0)),
        compiler_params=pltpu.CompilerParams(
            # Single step at small B keeps the resident-weight DMA on one core;
            # with many steps each core's bb*N rows amortize its own weight copy.
            dimension_semantics=("parallel",) if steps > 1 else ("arbitrary",),
            vmem_limit_bytes=vmem_limit),
    )(inp.astype(f32), q_flat, w_pack, vecs)


def init_params(key, queries_dim, dim, ff_dim):
    ks = jax.random.split(key, 16)
    s = 0.05
    n = lambda k, shp: s * jax.random.normal(k, shp, jnp.float32)
    return dict(
        wqk=n(ks[0], (queries_dim, dim)), bqk=n(ks[1], (queries_dim,)),
        ln1_g=1.0 + 0.1 * jax.random.normal(ks[2], (queries_dim,), jnp.float32),
        ln1_b=n(ks[3], (queries_dim,)),
        lnc_g=1.0 + 0.1 * jax.random.normal(ks[4], (dim,), jnp.float32),
        lnc_b=n(ks[5], (dim,)),
        wq=n(ks[6], (dim, queries_dim)),          # dead at context length 1 (kept for fidelity)
        wkv=n(ks[7], (2 * dim, dim)),
        wo=n(ks[8], (queries_dim, dim)), bo=n(ks[9], (queries_dim,)),
        ln2_g=1.0 + 0.1 * jax.random.normal(ks[10], (queries_dim,), jnp.float32),
        ln2_b=n(ks[11], (queries_dim,)),
        wf1=n(ks[12], (ff_dim, queries_dim)), bf1=n(ks[13], (ff_dim,)),
        wf2=n(ks[14], (queries_dim, ff_dim)), bf2=n(ks[15], (queries_dim,)),
    )


def reference_forward(inp, query, params):
    # Plain-JAX reference implementing the FULL module (including the softmax over the
    # single context token, to_q and LayerNorm(x)) at the same bf16-operand /
    # f32-accumulate precision, validating the kernel's algebraic simplification.
    f32, bf16 = jnp.float32, jnp.bfloat16
    B, N, Q = inp.shape
    D = params["wqk"].shape[1]

    def mm(a, w):                       # torch nn.Linear matmul: a @ w.T
        return jnp.dot(a.astype(bf16), w.T.astype(bf16), preferred_element_type=f32)

    def ln(v, g, b):
        mu = jnp.mean(v, axis=-1, keepdims=True)
        c = v - mu
        var = jnp.mean(c * c, axis=-1, keepdims=True)
        return c * jax.lax.rsqrt(var + 1e-5) * g + b

    def gelu(v):
        return 0.5 * v * (1.0 + jnp.tanh(0.7978845608028654 * (v + 0.044715 * v * v * v)))

    qf = query.reshape(B, D)
    ctx = mm(qf, params["wqk"]) + params["bqk"]                 # (B, Q)
    xn = ln(inp, params["ln1_g"], params["ln1_b"])
    cn = ln(ctx, params["lnc_g"], params["lnc_b"])

    q = mm(xn, params["wq"])                                    # (B, N, D)
    kv = mm(cn, params["wkv"])                                  # (B, 2D)
    k, v = kv[:, :D], kv[:, D:]
    sim = jnp.einsum("bnd,bd->bn", q, k) * (float(D) ** -0.5)
    attn = jax.nn.softmax(sim[..., None], axis=-1)              # == 1 (single key)
    attn_v = attn * v[:, None, :]                               # (B, N, D)
    attn_out = mm(attn_v, params["wo"]) + params["bo"]
    x2 = attn_out + inp

    x2n = ln(x2, params["ln2_g"], params["ln2_b"])
    h = gelu(mm(x2n, params["wf1"]) + params["bf1"])
    ff = mm(h, params["wf2"]) + params["bf2"]
    return ff + x2


if __name__ == "__main__":
    key = jax.random.PRNGKey(0)
    kp, kx, kq = jax.random.split(key, 3)

    B, N_SEQ = 2, 64
    C1, HQ, WQ = 4, 8, 8
    DIM = C1 * HQ * WQ            # 256 (== queries_dim; MXU-width lane dimension)
    QDIM = DIM
    FF = DIM                      # FeedForward(queries_dim, dim) hidden width

    params = init_params(kp, QDIM, DIM, FF)
    x = jax.random.normal(kx, (B, N_SEQ, QDIM), jnp.float32)
    query = jax.random.normal(kq, (B, C1, HQ, WQ), jnp.float32)

    out = align_latent_forward(x, query, params)
    out = jax.block_until_ready(out)

    ref = reference_forward(x, query, params)
    np.testing.assert_allclose(np.asarray(out), np.asarray(ref), rtol=2e-2, atol=2e-2)
    assert out.shape == (B, N_SEQ, QDIM)
    print("KERNEL_OK")
</pallas_src>

<mosaic_0001>
module attributes {stable_mosaic.version = 11 : i64} {
  func.func @_align_latent_kernel(%arg0: i32, %arg1: memref<2x64x256xf32, #tpu.memory_space<vmem>>, %arg2: memref<2x1x256xf32, #tpu.memory_space<vmem>>, %arg3: memref<5x256x256xbf16, #tpu.memory_space<vmem>>, %arg4: memref<8x256xf32, #tpu.memory_space<vmem>>, %arg5: memref<2x64x256xf32, #tpu.memory_space<vmem>>) attributes {dimension_semantics = [#tpu.dimension_semantics<arbitrary>], iteration_bounds = array<i64: 1>, scalar_prefetch = 0 : i64, scratch_operands = 0 : i64, tpu.core_type = #tpu.core_type<tc>, window_params = [{transform_indices = @transform_0, window_bounds = array<i64: 2, 64, 256>}, {transform_indices = @transform_1, window_bounds = array<i64: 2, 1, 256>}, {pipeline_mode = #tpu.pipeline_mode<synchronous>, transform_indices = @transform_2, window_bounds = array<i64: 5, 256, 256>}, {pipeline_mode = #tpu.pipeline_mode<synchronous>, transform_indices = @transform_3, window_bounds = array<i64: 8, 256>}, {transform_indices = @transform_4, window_bounds = array<i64: 2, 64, 256>}]} {
    %c0 = arith.constant 0 : index
    %c0_0 = arith.constant 0 : index
    %c0_1 = arith.constant 0 : index
    %0 = vector.load %arg1[%c0, %c0_0, %c0_1] : memref<2x64x256xf32, #tpu.memory_space<vmem>>, vector<2x64x256xf32>
    %c0_2 = arith.constant 0 : index
    %c0_3 = arith.constant 0 : index
    %c0_4 = arith.constant 0 : index
    %1 = vector.load %arg2[%c0_2, %c0_3, %c0_4] : memref<2x1x256xf32, #tpu.memory_space<vmem>>, vector<2x1x256xf32>
    %2 = vector.shape_cast %1 : vector<2x1x256xf32> to vector<2x256xf32>
    %c0_5 = arith.constant 0 : index
    %c0_6 = arith.constant 0 : index
    %c0_7 = arith.constant 0 : index
    %3 = vector.load %arg3[%c0_5, %c0_6, %c0_7] : memref<5x256x256xbf16, #tpu.memory_space<vmem>>, vector<1x256x256xbf16>
    %4 = vector.shape_cast %3 : vector<1x256x256xbf16> to vector<256x256xbf16>
    %5 = arith.truncf %2 : vector<2x256xf32> to vector<2x256xbf16>
    %cst = arith.constant dense<0.000000e+00> : vector<2x256xf32>
    %6 = tpu.matmul %5, %4, %cst {dimension_numbers = #tpu.dot_dimension_numbers<[1], [0], [0], [1], [0, 0, 1, 1], [], []>} : vector<2x256xbf16>, vector<256x256xbf16>, vector<2x256xf32> -> vector<2x256xf32>
    %c0_8 = arith.constant 0 : index
    %c0_9 = arith.constant 0 : index
    %7 = vector.load %arg4[%c0_8, %c0_9] : memref<8x256xf32, #tpu.memory_space<vmem>>, vector<1x256xf32>
    %8 = vector.broadcast %7 : vector<1x256xf32> to vector<2x256xf32>
    %9 = arith.addf %6, %8 : vector<2x256xf32>
    %c1 = arith.constant 1 : index
    %c0_10 = arith.constant 0 : index
    %10 = vector.load %arg4[%c1, %c0_10] : memref<8x256xf32, #tpu.memory_space<vmem>>, vector<1x256xf32>
    %c2 = arith.constant 2 : index
    %c0_11 = arith.constant 0 : index
    %11 = vector.load %arg4[%c2, %c0_11] : memref<8x256xf32, #tpu.memory_space<vmem>>, vector<1x256xf32>
    %cst_12 = arith.constant dense<0.000000e+00> : vector<2xf32>
    %12 = vector.multi_reduction <add>, %9, %cst_12 [1] : vector<2x256xf32> to vector<2xf32>
    %13 = vector.shape_cast %12 : vector<2xf32> to vector<2x1xf32>
    %cst_13 = arith.constant 2.560000e+02 : f32
    %14 = vector.broadcast %cst_13 : f32 to vector<2x1xf32>
    %15 = arith.divf %13, %14 : vector<2x1xf32>
    %16 = vector.broadcast %15 : vector<2x1xf32> to vector<2x256xf32>
    %17 = arith.subf %9, %16 : vector<2x256xf32>
    %18 = arith.mulf %17, %17 : vector<2x256xf32>
    %cst_14 = arith.constant dense<0.000000e+00> : vector<2xf32>
    %19 = vector.multi_reduction <add>, %18, %cst_14 [1] : vector<2x256xf32> to vector<2xf32>
    %20 = vector.shape_cast %19 : vector<2xf32> to vector<2x1xf32>
    %cst_15 = arith.constant 2.560000e+02 : f32
    %21 = vector.broadcast %cst_15 : f32 to vector<2x1xf32>
    %22 = arith.divf %20, %21 : vector<2x1xf32>
    %cst_16 = arith.constant 9.99999974E-6 : f32
    %23 = vector.broadcast %cst_16 : f32 to vector<2x1xf32>
    %24 = arith.addf %22, %23 : vector<2x1xf32>
    %25 = math.rsqrt %24 : vector<2x1xf32>
    %26 = vector.broadcast %25 : vector<2x1xf32> to vector<2x256xf32>
    %27 = arith.mulf %17, %26 : vector<2x256xf32>
    %28 = vector.broadcast %10 : vector<1x256xf32> to vector<2x256xf32>
    %29 = arith.mulf %27, %28 : vector<2x256xf32>
    %30 = vector.broadcast %11 : vector<1x256xf32> to vector<2x256xf32>
    %31 = arith.addf %29, %30 : vector<2x256xf32>
    %c1_17 = arith.constant 1 : index
    %c0_18 = arith.constant 0 : index
    %c0_19 = arith.constant 0 : index
    %32 = vector.load %arg3[%c1_17, %c0_18, %c0_19] : memref<5x256x256xbf16, #tpu.memory_space<vmem>>, vector<1x256x256xbf16>
    %33 = vector.shape_cast %32 : vector<1x256x256xbf16> to vector<256x256xbf16>
    %34 = arith.truncf %31 : vector<2x256xf32> to vector<2x256xbf16>
    %cst_20 = arith.constant dense<0.000000e+00> : vector<2x256xf32>
    %35 = tpu.matmul %34, %33, %cst_20 {dimension_numbers = #tpu.dot_dimension_numbers<[1], [0], [0], [1], [0, 0, 1, 1], [], []>} : vector<2x256xbf16>, vector<256x256xbf16>, vector<2x256xf32> -> vector<2x256xf32>
    %c2_21 = arith.constant 2 : index
    %c0_22 = arith.constant 0 : index
    %c0_23 = arith.constant 0 : index
    %36 = vector.load %arg3[%c2_21, %c0_22, %c0_23] : memref<5x256x256xbf16, #tpu.memory_space<vmem>>, vector<1x256x256xbf16>
    %37 = vector.shape_cast %36 : vector<1x256x256xbf16> to vector<256x256xbf16>
    %38 = arith.truncf %35 : vector<2x256xf32> to vector<2x256xbf16>
    %cst_24 = arith.constant dense<0.000000e+00> : vector<2x256xf32>
    %39 = tpu.matmul %38, %37, %cst_24 {dimension_numbers = #tpu.dot_dimension_numbers<[1], [0], [0], [1], [0, 0, 1, 1], [], []>} : vector<2x256xbf16>, vector<256x256xbf16>, vector<2x256xf32> -> vector<2x256xf32>
    %c3 = arith.constant 3 : index
    %c0_25 = arith.constant 0 : index
    %40 = vector.load %arg4[%c3, %c0_25] : memref<8x256xf32, #tpu.memory_space<vmem>>, vector<1x256xf32>
    %41 = vector.broadcast %40 : vector<1x256xf32> to vector<2x256xf32>
    %42 = arith.addf %39, %41 : vector<2x256xf32>
    %43 = vector.shape_cast %42 : vector<2x256xf32> to vector<2x1x256xf32>
    %44 = vector.broadcast %43 : vector<2x1x256xf32> to vector<2x64x256xf32>
    %45 = arith.addf %0, %44 : vector<2x64x256xf32>
    %46 = vector.shape_cast %45 : vector<2x64x256xf32> to vector<128x256xf32>
    %c4 = arith.constant 4 : index
    %c0_26 = arith.constant 0 : index
    %47 = vector.load %arg4[%c4, %c0_26] : memref<8x256xf32, #tpu.memory_space<vmem>>, vector<1x256xf32>
    %c5 = arith.constant 5 : index
    %c0_27 = arith.constant 0 : index
    %48 = vector.load %arg4[%c5, %c0_27] : memref<8x256xf32, #tpu.memory_space<vmem>>, vector<1x256xf32>
    %cst_28 = arith.constant dense<0.000000e+00> : vector<128xf32>
    %49 = vector.multi_reduction <add>, %46, %cst_28 [1] : vector<128x256xf32> to vector<128xf32>
    %50 = vector.shape_cast %49 : vector<128xf32> to vector<128x1xf32>
    %cst_29 = arith.constant 2.560000e+02 : f32
    %51 = vector.broadcast %cst_29 : f32 to vector<128x1xf32>
    %52 = arith.divf %50, %51 : vector<128x1xf32>
    %53 = vector.broadcast %52 : vector<128x1xf32> to vector<128x256xf32>
    %54 = arith.subf %46, %53 : vector<128x256xf32>
    %55 = arith.mulf %54, %54 : vector<128x256xf32>
    %cst_30 = arith.constant dense<0.000000e+00> : vector<128xf32>
    %56 = vector.multi_reduction <add>, %55, %cst_30 [1] : vector<128x256xf32> to vector<128xf32>
    %57 = vector.shape_cast %56 : vector<128xf32> to vector<128x1xf32>
    %cst_31 = arith.constant 2.560000e+02 : f32
    %58 = vector.broadcast %cst_31 : f32 to vector<128x1xf32>
    %59 = arith.divf %57, %58 : vector<128x1xf32>
    %cst_32 = arith.constant 9.99999974E-6 : f32
    %60 = vector.broadcast %cst_32 : f32 to vector<128x1xf32>
    %61 = arith.addf %59, %60 : vector<128x1xf32>
    %62 = math.rsqrt %61 : vector<128x1xf32>
    %63 = vector.broadcast %62 : vector<128x1xf32> to vector<128x256xf32>
    %64 = arith.mulf %54, %63 : vector<128x256xf32>
    %65 = vector.broadcast %47 : vector<1x256xf32> to vector<128x256xf32>
    %66 = arith.mulf %64, %65 : vector<128x256xf32>
    %67 = vector.broadcast %48 : vector<1x256xf32> to vector<128x256xf32>
    %68 = arith.addf %66, %67 : vector<128x256xf32>
    %c3_33 = arith.constant 3 : index
    %c0_34 = arith.constant 0 : index
    %c0_35 = arith.constant 0 : index
    %69 = vector.load %arg3[%c3_33, %c0_34, %c0_35] : memref<5x256x256xbf16, #tpu.memory_space<vmem>>, vector<1x256x256xbf16>
    %70 = vector.shape_cast %69 : vector<1x256x256xbf16> to vector<256x256xbf16>
    %71 = arith.truncf %68 : vector<128x256xf32> to vector<128x256xbf16>
    %cst_36 = arith.constant dense<0.000000e+00> : vector<128x256xf32>
    %72 = tpu.matmul %71, %70, %cst_36 {dimension_numbers = #tpu.dot_dimension_numbers<[1], [0], [0], [1], [0, 0, 1, 1], [], []>} : vector<128x256xbf16>, vector<256x256xbf16>, vector<128x256xf32> -> vector<128x256xf32>
    %c6 = arith.constant 6 : index
    %c0_37 = arith.constant 0 : index
    %73 = vector.load %arg4[%c6, %c0_37] : memref<8x256xf32, #tpu.memory_space<vmem>>, vector<1x256xf32>
    %74 = vector.broadcast %73 : vector<1x256xf32> to vector<128x256xf32>
    %75 = arith.addf %72, %74 : vector<128x256xf32>
    %cst_38 = arith.constant 5.000000e-01 : f32
    %76 = vector.broadcast %cst_38 : f32 to vector<128x256xf32>
    %77 = arith.mulf %76, %75 : vector<128x256xf32>
    %cst_39 = arith.constant 4.471500e-02 : f32
    %78 = vector.broadcast %cst_39 : f32 to vector<128x256xf32>
    %79 = arith.mulf %78, %75 : vector<128x256xf32>
    %80 = arith.mulf %79, %75 : vector<128x256xf32>
    %81 = arith.mulf %80, %75 : vector<128x256xf32>
    %82 = arith.addf %75, %81 : vector<128x256xf32>
    %cst_40 = arith.constant 0.797884583 : f32
    %83 = vector.broadcast %cst_40 : f32 to vector<128x256xf32>
    %84 = arith.mulf %83, %82 : vector<128x256xf32>
    %85 = math.tanh %84 : vector<128x256xf32>
    %cst_41 = arith.constant 1.000000e+00 : f32
    %86 = vector.broadcast %cst_41 : f32 to vector<128x256xf32>
    %87 = arith.addf %86, %85 : vector<128x256xf32>
    %88 = arith.mulf %77, %87 : vector<128x256xf32>
    %c4_42 = arith.constant 4 : index
    %c0_43 = arith.constant 0 : index
    %c0_44 = arith.constant 0 : index
    %89 = vector.load %arg3[%c4_42, %c0_43, %c0_44] : memref<5x256x256xbf16, #tpu.memory_space<vmem>>, vector<1x256x256xbf16>
    %90 = vector.shape_cast %89 : vector<1x256x256xbf16> to vector<256x256xbf16>
    %91 = arith.truncf %88 : vector<128x256xf32> to vector<128x256xbf16>
    %cst_45 = arith.constant dense<0.000000e+00> : vector<128x256xf32>
    %92 = tpu.matmul %91, %90, %cst_45 {dimension_numbers = #tpu.dot_dimension_numbers<[1], [0], [0], [1], [0, 0, 1, 1], [], []>} : vector<128x256xbf16>, vector<256x256xbf16>, vector<128x256xf32> -> vector<128x256xf32>
    %c7 = arith.constant 7 : index
    %c0_46 = arith.constant 0 : index
    %93 = vector.load %arg4[%c7, %c0_46] : memref<8x256xf32, #tpu.memory_space<vmem>>, vector<1x256xf32>
    %94 = vector.broadcast %93 : vector<1x256xf32> to vector<128x256xf32>
    %95 = arith.addf %92, %94 : vector<128x256xf32>
    %96 = arith.addf %95, %46 : vector<128x256xf32>
    %97 = vector.shape_cast %96 : vector<128x256xf32> to vector<2x64x256xf32>
    %c0_47 = arith.constant 0 : index
    %c0_48 = arith.constant 0 : index
    %c0_49 = arith.constant 0 : index
    %98 = vector.load %arg5[%c0_47, %c0_48, %c0_49] : memref<2x64x256xf32, #tpu.memory_space<vmem>>, vector<2x64x256xf32>
    tpu.vector_store %arg5[%c0_47, %c0_48, %c0_49], %97 {strides = array<i32>} : memref<2x64x256xf32, #tpu.memory_space<vmem>>, vector<2x64x256xf32>,
    return
  }
  func.func @transform_0(%arg0: i32) -> (i32, i32, i32) {
    %c0_i32 = arith.constant 0 : i32
    %c0_i32_0 = arith.constant 0 : i32
    %c0_i32_1 = arith.constant 0 : i32
    return %arg0, %c0_i32, %c0_i32_0 : i32, i32, i32
  }
  func.func @transform_1(%arg0: i32) -> (i32, i32, i32) {
    %c0_i32 = arith.constant 0 : i32
    %c0_i32_0 = arith.constant 0 : i32
    %c0_i32_1 = arith.constant 0 : i32
    return %arg0, %c0_i32, %c0_i32_0 : i32, i32, i32
  }
  func.func @transform_2(%arg0: i32) -> (i32, i32, i32) {
    %c0_i32 = arith.constant 0 : i32
    %c0_i32_0 = arith.constant 0 : i32
    %c0_i32_1 = arith.constant 0 : i32
    %c0_i32_2 = arith.constant 0 : i32
    return %c0_i32, %c0_i32_0, %c0_i32_1 : i32, i32, i32
  }
  func.func @transform_3(%arg0: i32) -> (i32, i32) {
    %c0_i32 = arith.constant 0 : i32
    %c0_i32_0 = arith.constant 0 : i32
    %c0_i32_1 = arith.constant 0 : i32
    return %c0_i32, %c0_i32_0 : i32, i32
  }
  func.func @transform_4(%arg0: i32) -> (i32, i32, i32) {
    %c0_i32 = arith.constant 0 : i32
    %c0_i32_0 = arith.constant 0 : i32
    %c0_i32_1 = arith.constant 0 : i32
    return %arg0, %c0_i32, %c0_i32_0 : i32, i32, i32
  }
}

</mosaic_0001>

<bundles_post_ra>
// kernel: tpu_custom_call.1
= control target key start
LH: loop header
LB: loop body
LE: loop exit
PB: predicated region body
PF: predicated region fallthrough
CT: control target
= control target key end

     0   :  { %9 = vsyncpa [#allocation3], 0  ;;  %s3930_s0 = inlined_call_operand.hbm [shape: f32[2,64,256], index: 0, kind: input, shape index: {}]   ;;  %s3931_s1 = inlined_call_operand.hbm [shape: f32[2,1,256], index: 1, kind: input, shape index: {}]   ;;  %s3932_s2 = inlined_call_operand.hbm [shape: bf16[5,256,256], index: 2, kind: input, shape index: {}]   ;;  %s3933_s3 = inlined_call_operand.hbm [shape: f32[8,256], index: 3, kind: input, shape index: {}]   ;;  %s3934_s4 = inlined_call_operand.hbm [shape: f32[2,64,256], index: 4, kind: output, shape index: {}]  }
   0x1   :  { %10 = vsyncpa [#allocation6], 0 }
   0x2   :  { %11 = vsyncpa [#allocation9], 0 }
   0x3   :  { %12 = vsyncpa [#allocation4], 0  ;;  %s3044_s15 = smov [#allocation5]  }
   0x4   :  { %s30_s16 = sshll.u32 %s3044_s15, 4  ;;  %s31_s16 = int_to_ptr.vmem [resolvable:$true] %s30_s16 }
   0x5   :  { %s2944_s17 = scalar_lea.vmem %s31_s16, 64  ;;  %p2949_p1 = scmp.lt.s32.totalorder %s31_s16, %s31_s16 }
   0x6   :  { %p2945_p0 = scmp.ne.s32.totalorder %s31_s16, %s2944_s17  ;;  %p2950_p2 = scmp.lt.s32.totalorder %s2944_s17, %s2944_s17 }
   0x8   :  { %p2951_p3 = por %p2950_p2, %p2949_p1 }
   0xa   :  { %p2952_p4 = pnand %p2951_p3, %p2945_p0 }
   0xc   :  { %2955 = shalt.err (!%p2952_p4)
}
   0xd   :  { %s3045_s18 = smov 32   ;;  %s3046_s19 = smov 2  }
   0xe   :  { %36 = dma.hbm_to_vmem [thread:$0]  %s3931_s1, 64, %s31_s16, [#allocation6], %s3045_s18, %s3045_s18, %s3046_s19  }
   0xf   :  { %s3047_s22 = smov [#allocation2]  }
  0x10   :  { %s18_s23 = sshll.u32 %s3047_s22, 4  ;;  %s19_s23 = int_to_ptr.vmem [resolvable:$true] %s18_s23 }
  0x11   :  { %s2964_s24 = scalar_lea.vmem %s19_s23, 4096  ;;  %p2969_p6 = scmp.lt.s32.totalorder %s19_s23, %s19_s23 }
  0x12   :  { %p2965_p5 = scmp.ne.s32.totalorder %s19_s23, %s2964_s24  ;;  %p2970_p7 = scmp.lt.s32.totalorder %s2964_s24, %s2964_s24 }
  0x14   :  { %p2971_p8 = por %p2970_p7, %p2969_p6 }
  0x16   :  { %p2972_p9 = pnand %p2971_p8, %p2965_p5 }
  0x18   :  { %2975 = shalt.err (!%p2972_p9)
}
  0x19   :  { %s3048_s25 = smov 256   ;;  %s3049_s26 = smov 16  }
  0x1a   :  { %24 = dma.hbm_to_vmem [thread:$0]  %s3930_s0, 4096, %s19_s23, [#allocation3], %s3048_s25, %s3048_s25, %s3049_s26  }
  0x1b   :  { %s3050_s1 = smov [#allocation7]  }
  0x1c   :  { %s42_s29 = sshll.u32 %s3050_s1, 4  ;;  %s43_s29 = int_to_ptr.vmem [resolvable:$true] %s42_s29 }
  0x1d   :  { %s2984_s30 = scalar_lea.vmem %s43_s29, 20480  ;;  %p2989_p11 = scmp.lt.s32.totalorder %s43_s29, %s43_s29 }
  0x1e   :  { %p2985_p10 = scmp.ne.s32.totalorder %s43_s29, %s2984_s30  ;;  %p2990_p12 = scmp.lt.s32.totalorder %s2984_s30, %s2984_s30 }
  0x20   :  { %p2991_p13 = por %p2990_p12, %p2989_p11 }
  0x22   :  { %p2992_p0 = pnand %p2991_p13, %p2985_p10 }
  0x24   :  { %2995 = shalt.err (!%p2992_p0)
}
  0x25   :  { %s3051_s5 = smov 128   ;;  %s3052_s6 = smov 8  }
  0x26   :  { %48 = dma.hbm_to_vmem [thread:$0]  %s3932_s2, 20480, %s43_s29, [#allocation6], %s3051_s5, %s3051_s5, %s3052_s6  }
  0x27   :  { %s3053_s9 = smov [#allocation8]  }
  0x28   :  { %s55_s10 = sshll.u32 %s3053_s9, 4  ;;  %s56_s10 = int_to_ptr.vmem [resolvable:$true] %s55_s10 }
  0x29   :  { %s3004_s0 = scalar_lea.vmem %s56_s10, 256  ;;  %p3009_p2 = scmp.lt.s32.totalorder %s56_s10, %s56_s10 }
  0x2a   :  { %p3005_p1 = scmp.ne.s32.totalorder %s56_s10, %s3004_s0  ;;  %p3010_p3 = scmp.lt.s32.totalorder %s3004_s0, %s3004_s0 }
  0x2c   :  { %p3011_p4 = por %p3010_p3, %p3009_p2 }
  0x2e   :  { %p3012_p5 = pnand %p3011_p4, %p3005_p1 }
  0x30   :  { %3015 = shalt.err (!%p3012_p5)
}
  0x31   :  { %58 = dma.hbm_to_vmem [thread:$0]  %s3933_s3, 256, %s56_s10, [#allocation9]  }
  0x32   :  { %3036 = dma.done.wait [#allocation3], 4096  }
  0x33   :  { %3037 = vsyncadd [#allocation3], 4294963200 }
  0x34   :  { %3038 = dma.done.wait [#allocation6], 20544  }
  0x35   :  { %3039 = vsyncadd [#allocation6], 4294946752 }
  0x36   :  { %3040 = dma.done.wait [#allocation9], 256  }
  0x37   :  { %3041 = vsyncadd [#allocation9], 4294967040  ;;  %v2598_v0 = vld [vmem:[#allocation7 + $0x74] ss:$8 sps:$4 sm:$0xff]   ;;  %v2600_v1 = vld [vmem:[#allocation7 + $0x70] ss:$8 sps:$4 sm:$0xff]   ;;  %v139_v7 = vlaneseq }
  0x38   :  { %352 = vmatprep.subr.bf16.mxu0 %v2598_v0  ;;  %v2601_v2 = vld [vmem:[#allocation7 + $0x64] ss:$8 sps:$4 sm:$0xff]   ;;  %v2603_v3 = vld [vmem:[#allocation7 + $0x60] ss:$8 sps:$4 sm:$0xff]   ;;  %v2604_v4 = vld [vmem:[#allocation7 + $0x54] ss:$8 sps:$4 sm:$0xff]  }
  0x39   :  { %353 = vmatpush1.bf16.msra.mxu0 %v2600_v1  ;;  %v2606_v5 = vld [vmem:[#allocation7 + $0x50] ss:$8 sps:$4 sm:$0xff]   ;;  %v2607_v6 = vld [vmem:[#allocation7 + $0x44] ss:$8 sps:$4 sm:$0xff]   ;;  %v2609_v8 = vld [vmem:[#allocation7 + $0x40] ss:$8 sps:$4 sm:$0xff]  }
  0x3a   :  { %354 = vmatprep.subr.bf16.mxu0 %v2601_v2  ;;  %v2610_v9 = vld [vmem:[#allocation7 + $0x34] ss:$8 sps:$4 sm:$0xff]   ;;  %v3096_v10 = vshrl.u32 %v139_v7, 7  ;;  %v2612_v11 = vld [vmem:[#allocation7 + $0x30] ss:$8 sps:$4 sm:$0xff]   ;;  %vm184_vm0 = vcmask 1041409  }
  0x3b   :  { %v2613_v12 = vld [vmem:[#allocation7 + $0x24] ss:$8 sps:$4 sm:$0xff]   ;;  %v2615_v14 = vld [vmem:[#allocation7 + $0x20] ss:$8 sps:$4 sm:$0xff]   ;;  %v2616_v15 = vld [vmem:[#allocation7 + $0x14] ss:$8 sps:$4 sm:$0xff]  }
  0x3c   :  { %v3099_v13 = vsub.s32 1, %v3096_v10  ;;  %v2618_v16 = vld [vmem:[#allocation7 + $0x10] ss:$8 sps:$4 sm:$0xff]   ;;  %v103_v17 = vld [vmem:[#allocation5] sm:$0x3]  ;;  %v3105_v37 = vsub.s32 0, %v3096_v10 }
  0x3d   :  { %355 = vmatpush1.bf16.msra.mxu0 %v2603_v3  ;;  %v104_v18 = vld [vmem:[#allocation5 + $0x2] sm:$0x3]  ;;  %v2619_v19 = vld [vmem:[#allocation7 + $0x4] ss:$8 sps:$4 sm:$0xff]   ;;  %v2621_v24 = vld [vmem:[#allocation7] ss:$8 sps:$4 sm:$0xff]  }
  0x3e   :  { %356 = vmatprep.subr.bf16.mxu0 %v2604_v4  ;;  %3972 = vst [vmem:[#allocation15_spill] sm:$0xff] %v3099_v13  ;;  %v146_v20 = vrot.slane %v103_v17, %v3099_v13  ;;  %v154_v21 = vrot.slane %v104_v18, %v3099_v13  ;;  %v2622_v25 = vld [vmem:[#allocation7 + $0xf4] ss:$8 sps:$4 sm:$0xff]   ;;  %v2624_v29 = vld [vmem:[#allocation7 + $0xf0] ss:$8 sps:$4 sm:$0xff]   ;;  %3973 = vst [vmem:[#allocation16_spill] sm:$0xff] %v3105_v37  ;;  %v150_v40 = vrot.slane %v104_v18, %v3105_v37 }
  0x3f   :  { %v2625_v30 = vld [vmem:[#allocation7 + $0xe4] ss:$8 sps:$4 sm:$0xff]   ;;  %v2627_v33 = vld [vmem:[#allocation7 + $0xe0] ss:$8 sps:$4 sm:$0xff]   ;;  %v2628_v34 = vld [vmem:[#allocation7 + $0xd4] ss:$8 sps:$4 sm:$0xff]   ;;  %v142_v43 = vrot.slane %v103_v17, %v3105_v37 }
  0x40   :  { %v160_v22 = vpack.c.bf16 %v146_v20, %v146_v20  ;;  %v162_v23 = vpack.c.bf16 %v154_v21, %v154_v21  ;;  %v2630_v35 = vld [vmem:[#allocation7 + $0xd0] ss:$8 sps:$4 sm:$0xff]   ;;  %v2631_v36 = vld [vmem:[#allocation7 + $0xc4] ss:$8 sps:$4 sm:$0xff]   ;;  %v2633_v38 = vld [vmem:[#allocation7 + $0xc0] ss:$8 sps:$4 sm:$0xff]   ;;  %v161_v44 = vpack.c.bf16 %v150_v40, %v150_v40 }
  0x41   :  { %357 = vmatpush1.bf16.msra.mxu0 %v2606_v5  ;;  %v2634_v39 = vld [vmem:[#allocation7 + $0xb4] ss:$8 sps:$4 sm:$0xff]   ;;  %v2636_v41 = vld [vmem:[#allocation7 + $0xb0] ss:$8 sps:$4 sm:$0xff]   ;;  %v2637_v42 = vld [vmem:[#allocation7 + $0xa4] ss:$8 sps:$4 sm:$0xff]   ;;  %v159_v47 = vpack.c.bf16 %v142_v43, %v142_v43 }
  0x42   :  { %358 = vmatprep.subr.bf16.mxu0 %v2607_v6  ;;  %v180_v26 = vunpack.c.l.b16 %v160_v22  ;;  %v182_v27 = vunpack.c.l.b16 %v162_v23  ;;  %v2639_v45 = vld [vmem:[#allocation7 + $0xa0] ss:$8 sps:$4 sm:$0xff]   ;;  %v2640_v46 = vld [vmem:[#allocation7 + $0x94] ss:$8 sps:$4 sm:$0xff]   ;;  %v181_v48 = vunpack.c.l.b16 %v161_v44  ;;  %v2642_v49 = vld [vmem:[#allocation7 + $0x90] ss:$8 sps:$4 sm:$0xff]  }
  0x43   :  { %v2643_v50 = vld [vmem:[#allocation7 + $0x84] ss:$8 sps:$4 sm:$0xff]   ;;  %v179_v51 = vunpack.c.l.b16 %v159_v47  ;;  %v2645_v53 = vld [vmem:[#allocation7 + $0x80] ss:$8 sps:$4 sm:$0xff]   ;;  %vm397_vm1 = vcmask 1041408   ;;  %s3055_s2 = smov [#allocation10]  }
  0x44   :  { %v186_v28 = vrot.slane %v182_v27, 7  ;;  %v183_v52 = vrot.slane %v181_v48, 7  ;;  %v163_v56 = vld [vmem:[#allocation8] ss:$8 sm:$0x3]  ;;  %s2380_s3 = sshll.u32 %s3055_s2, 4  ;;  %s2381_s3 = int_to_ptr.vmem [resolvable:$true] %s2380_s3 }
  0x45   :  { %359 = vmatpush1.bf16.msra.mxu0 %v2609_v8  ;;  %v168_v57 = vrot.slane %v163_v56, %v3105_v37  ;;  %v172_v58 = vrot.slane %v163_v56, %v3099_v13  ;;  %v2646_v4 = vld [vmem:[#allocation7 + $0x174] ss:$8 sps:$4 sm:$0xff]   ;;  %v2648_v5 = vld [vmem:[#allocation7 + $0x170] ss:$8 sps:$4 sm:$0xff]   ;;  %v2649_v6 = vld [vmem:[#allocation7 + $0x164] ss:$8 sps:$4 sm:$0xff]   ;;  %p3021_p7 = scmp.lt.s32.totalorder %s2381_s3, %s2381_s3 }
  0x46   :  { %360 = vmatprep.subr.bf16.mxu0 %v2610_v9  ;;  %v187_v31 = vsel %vm184_vm0, %v186_v28, %v180_v26  ;;  %v185_v54 = vsel %vm184_vm0, %v183_v52, %v179_v51  ;;  %640 = vmatprep.subr.bf16.mxu1 %v2646_v4  ;;  %v2651_v7 = vld [vmem:[#allocation7 + $0x160] ss:$8 sps:$4 sm:$0xff]   ;;  %v2652_v8 = vld [vmem:[#allocation7 + $0x154] ss:$8 sps:$4 sm:$0xff]   ;;  %v2654_v9 = vld [vmem:[#allocation7 + $0x150] ss:$8 sps:$4 sm:$0xff]  }
  0x47   :  { %v189_v32 = vpack.c.b16 %v187_v31, %v187_v31  ;;  %v188_v55 = vpack.c.b16 %v185_v54, %v185_v54  ;;  %641 = vmatpush1.bf16.msra.mxu1 %v2648_v5  ;;  %v2663_v17 = vld [vmem:[#allocation7 + $0x120] ss:$8 sps:$4 sm:$0xff]   ;;  %v2664_v18 = vld [vmem:[#allocation7 + $0x114] ss:$8 sps:$4 sm:$0xff]   ;;  %v2667_v20 = vld [vmem:[#allocation7 + $0x104] ss:$8 sps:$4 sm:$0xff]  }
  0x48   :  { %642 = vmatprep.subr.bf16.mxu1 %v2649_v6  ;;  %v2669_v21 = vld [vmem:[#allocation7 + $0x100] ss:$8 sps:$4 sm:$0xff]   ;;  %v2670_v22 = vld [vmem:[#allocation7 + $0x1f4] ss:$8 sps:$4 sm:$0xff]   ;;  %v2672_v23 = vld [vmem:[#allocation7 + $0x1f0] ss:$8 sps:$4 sm:$0xff]  }
  0x49   :  { %361 = vmatpush1.bf16.msra.mxu0 %v2612_v11  ;;  %384 = vmatprep.mubr.bf16.mxu0 %v189_v32  ;;  %v2655_v11 = vld [vmem:[#allocation7 + $0x144] ss:$8 sps:$4 sm:$0xff]   ;;  %v2682_v40 = vld [vmem:[#allocation7 + $0x1b4] ss:$8 sps:$4 sm:$0xff]   ;;  %v2687_v43 = vld [vmem:[#allocation7 + $0x1a0] ss:$8 sps:$4 sm:$0xff]  }
  0x4a   :  { %362 = vmatprep.subr.bf16.mxu0 %v2613_v12  ;;  %v2657_v12 = vld [vmem:[#allocation7 + $0x140] ss:$8 sps:$4 sm:$0xff]   ;;  %v2688_v44 = vld [vmem:[#allocation7 + $0x194] ss:$8 sps:$4 sm:$0xff]   ;;  %v2694_v48 = vld [vmem:[#allocation7 + $0x270] ss:$8 sps:$4 sm:$0xff]  }
  0x4b   :  { %643 = vmatpush1.bf16.msra.mxu1 %v2651_v7  ;;  %v2693_v47 = vld [vmem:[#allocation7 + $0x180] ss:$8 sps:$4 sm:$0xff]   ;;  %v2702_v52 = vld [vmem:[#allocation7 + $0x254] ss:$8 sps:$4 sm:$0xff]   ;;  %v2705_v54 = vld [vmem:[#allocation7 + $0x244] ss:$8 sps:$4 sm:$0xff]  }
  0x4c   :  { %644 = vmatprep.subr.bf16.mxu1 %v2652_v8  ;;  %v2697_v51 = vld [vmem:[#allocation7 + $0x260] ss:$8 sps:$4 sm:$0xff]   ;;  %v2708_v56 = vld [vmem:[#allocation7 + $0x234] ss:$8 sps:$4 sm:$0xff]   ;;  %v2724_v5 = vld [vmem:[#allocation7 + $0x2d0] ss:$8 sps:$4 sm:$0xff]  }
  0x4d   :  { %363 = vmatpush1.bf16.msra.mxu0 %v2615_v14  ;;  %v2658_v14 = vld [vmem:[#allocation7 + $0x134] ss:$8 sps:$4 sm:$0xff]   ;;  %v2729_v6 = vld [vmem:[#allocation7 + $0x2c4] ss:$8 sps:$4 sm:$0xff]   ;;  %v2727_v7 = vld [vmem:[#allocation7 + $0x2c0] ss:$8 sps:$4 sm:$0xff]  }
  0x4e   :  { %364 = vmatprep.subr.bf16.mxu0 %v2616_v15  ;;  %v2660_v15 = vld [vmem:[#allocation7 + $0x130] ss:$8 sps:$4 sm:$0xff]   ;;  %v2726_v4 = vld [vmem:[#allocation7 + $0x2d4] ss:$8 sps:$4 sm:$0xff]   ;;  %s3016_s13 = scalar_lea.vmem %s2381_s3, 4096 }
  0x4f   :  { %645 = vmatpush1.bf16.msra.mxu1 %v2654_v9  ;;  %v2732_v8 = vld [vmem:[#allocation7 + $0x2b4] ss:$8 sps:$4 sm:$0xff]   ;;  %v2730_v9 = vld [vmem:[#allocation7 + $0x2b0] ss:$8 sps:$4 sm:$0xff]   ;;  %p3017_p6 = scmp.ne.s32.totalorder %s2381_s3, %s3016_s13  ;;  %p3022_p8 = scmp.lt.s32.totalorder %s3016_s13, %s3016_s13 }
  0x50   :  { %646 = vmatprep.subr.bf16.mxu1 %v2655_v11  ;;  %v2735_v11 = vld [vmem:[#allocation7 + $0x2a4] ss:$8 sps:$4 sm:$0xff]  }
  0x51   :  { %365 = vmatpush1.bf16.msra.mxu0 %v2618_v16  ;;  %v2661_v16 = vld [vmem:[#allocation7 + $0x124] ss:$8 sps:$4 sm:$0xff]   ;;  %p3023_p9 = por %p3022_p8, %p3021_p7 }
  0x52   :  { %366 = vmatprep.subr.bf16.mxu0 %v2619_v19  ;;  %v2666_v19 = vld [vmem:[#allocation7 + $0x110] ss:$8 sps:$4 sm:$0xff]  }
  0x53   :  { %647 = vmatpush1.bf16.msra.mxu1 %v2657_v12  ;;  %v2733_v12 = vld [vmem:[#allocation7 + $0x2a0] ss:$8 sps:$4 sm:$0xff]   ;;  %p3024_p10 = pnand %p3023_p9, %p3017_p6 }
  0x54   :  { %648 = vmatprep.subr.bf16.mxu1 %v2658_v14  ;;  %v2738_v14 = vld [vmem:[#allocation7 + $0x294] ss:$8 sps:$4 sm:$0xff]  }
  0x55   :  { %367 = vmatpush1.bf16.msra.mxu0 %v2621_v24  ;;  %v2673_v24 = vld [vmem:[#allocation7 + $0x1e4] ss:$8 sps:$4 sm:$0xff]  }
  0x56   :  { %368 = vmatprep.subr.bf16.mxu0 %v2622_v25 }
  0x57   :  { %649 = vmatpush1.bf16.msra.mxu1 %v2660_v15  ;;  %v2736_v15 = vld [vmem:[#allocation7 + $0x290] ss:$8 sps:$4 sm:$0xff]  }
  0x58   :  { %650 = vmatprep.subr.bf16.mxu1 %v2661_v16 }
  0x59   :  { %369 = vmatpush2.bf16.msra.mxu0 %v2624_v29 }
  0x5a   :  { %370 = vmatprep.subr.bf16.mxu0 %v2625_v30 }
  0x5b   :  { %651 = vmatpush1.bf16.msra.mxu1 %v2663_v17 }
  0x5c   :  { %652 = vmatprep.subr.bf16.mxu1 %v2664_v18 }
  0x5d   :  { %371 = vmatpush2.bf16.msra.mxu0 %v2627_v33 }
  0x5e   :  { %372 = vmatprep.subr.bf16.mxu0 %v2628_v34  ;;  %v2675_v34 = vld [vmem:[#allocation7 + $0x1e0] ss:$8 sps:$4 sm:$0xff]  }
  0x5f   :  { %653 = vmatpush1.bf16.msra.mxu1 %v2666_v19  ;;  %v394_v19 = vld [vmem:[#allocation8 + $0x1] ss:$8 sm:$0x3] }
  0x60   :  { %654 = vmatprep.subr.bf16.mxu1 %v2667_v20  ;;  %v396_v20 = vld [vmem:[#allocation8 + $0x2] ss:$8 sm:$0x3] }
  0x61   :  { %373 = vmatpush2.bf16.msra.mxu0 %v2630_v35  ;;  %v2676_v35 = vld [vmem:[#allocation7 + $0x1d4] ss:$8 sps:$4 sm:$0xff]  }
  0x62   :  { %374 = vmatprep.subr.bf16.mxu0 %v2631_v36  ;;  %v2678_v36 = vld [vmem:[#allocation7 + $0x1d0] ss:$8 sps:$4 sm:$0xff]  }
  0x63   :  { %655 = vmatpush1.bf16.msra.mxu1 %v2669_v21  ;;  %v423_v21 = vrot.slane %v394_v19, %v3105_v37 }
  0x64   :  { %656 = vmatprep.subr.bf16.mxu1 %v2670_v22  ;;  %v427_v22 = vrot.slane %v394_v19, %v3099_v13  ;;  %v84_v19 = vld [vmem:[#allocation2 + $0x68] sm:$0xff] }
  0x65   :  { %375 = vmatpush2.bf16.msra.mxu0 %v2633_v38  ;;  %v2679_v38 = vld [vmem:[#allocation7 + $0x1c4] ss:$8 sps:$4 sm:$0xff]  }
  0x66   :  { %376 = vmatprep.subr.bf16.mxu0 %v2634_v39  ;;  %v2681_v39 = vld [vmem:[#allocation7 + $0x1c0] ss:$8 sps:$4 sm:$0xff]  }
  0x67   :  { %657 = vmatpush2.bf16.msra.mxu1 %v2672_v23 }
  0x68   :  { %658 = vmatprep.subr.bf16.mxu1 %v2673_v24 }
  0x69   :  { %377 = vmatpush2.bf16.msra.mxu0 %v2636_v41  ;;  %v2684_v41 = vld [vmem:[#allocation7 + $0x1b0] ss:$8 sps:$4 sm:$0xff]  }
  0x6a   :  { %378 = vmatprep.subr.bf16.mxu0 %v2637_v42  ;;  %v2685_v42 = vld [vmem:[#allocation7 + $0x1a4] ss:$8 sps:$4 sm:$0xff]  }
  0x6b   :  { %659 = vmatpush2.bf16.msra.mxu1 %v2675_v34 }
  0x6c   :  { %660 = vmatprep.subr.bf16.mxu1 %v2676_v35 }
  0x6d   :  { %379 = vmatpush2.bf16.msra.mxu0 %v2639_v45  ;;  %v2690_v45 = vld [vmem:[#allocation7 + $0x190] ss:$8 sps:$4 sm:$0xff]  }
  0x6e   :  { %380 = vmatprep.subr.bf16.mxu0 %v2640_v46  ;;  %v2691_v46 = vld [vmem:[#allocation7 + $0x184] ss:$8 sps:$4 sm:$0xff]  }
  0x6f   :  { %661 = vmatpush2.bf16.msra.mxu1 %v2678_v36  ;;  %v2741_v36 = vld [vmem:[#allocation7 + $0x284] ss:$8 sps:$4 sm:$0xff]  }
  0x70   :  { %662 = vmatprep.subr.bf16.mxu1 %v2679_v38  ;;  %v2739_v38 = vld [vmem:[#allocation7 + $0x280] ss:$8 sps:$4 sm:$0xff]  }
  0x71   :  { %381 = vmatpush2.bf16.msra.mxu0 %v2642_v49  ;;  %v2696_v49 = vld [vmem:[#allocation7 + $0x274] ss:$8 sps:$4 sm:$0xff]  }
  0x72   :  { %382 = vmatprep.subr.bf16.mxu0 %v2643_v50  ;;  %v2699_v50 = vld [vmem:[#allocation7 + $0x264] ss:$8 sps:$4 sm:$0xff]  }
  0x73   :  { %663 = vmatpush2.bf16.msra.mxu1 %v2681_v39 }
  0x74   :  { %664 = vmatprep.subr.bf16.mxu1 %v2682_v40 }
  0x75   :  { %383 = vmatpush2.bf16.msra.mxu0 %v2645_v53  ;;  %v2700_v53 = vld [vmem:[#allocation7 + $0x250] ss:$8 sps:$4 sm:$0xff]  }
  0x76   :  { %889 = vmatprep.subr.bf16.mxu0 %v2696_v49 }
  0x77   :  { %665 = vmatpush2.bf16.msra.mxu1 %v2684_v41 }
  0x78   :  { %385 = vmatmul.mubr.bf16.vlgmr.msra.gmra.mxu0 %v188_v55  ;;  %666 = vmatprep.subr.bf16.mxu1 %v2685_v42  ;;  %v2703_v55 = vld [vmem:[#allocation7 + $0x240] ss:$8 sps:$4 sm:$0xff]  }
  0x79   :  { %890 = vmatpush1.bf16.msra.mxu0 %v2694_v48 }
  0x7a   :  { %891 = vmatprep.subr.bf16.mxu0 %v2699_v50 }
  0x7b   :  { %667 = vmatpush2.bf16.msra.mxu1 %v2687_v43 }
  0x7c   :  { %668 = vmatprep.subr.bf16.mxu1 %v2688_v44 }
  0x7d   :  { %892 = vmatpush1.bf16.msra.mxu0 %v2697_v51 }
  0x7e   :  { %893 = vmatprep.subr.bf16.mxu0 %v2702_v52 }
  0x7f   :  { %669 = vmatpush2.bf16.msra.mxu1 %v2690_v45  ;;  %v717_v45 = vld [vmem:[#allocation8 + $0x3] ss:$8 sm:$0x3] }
  0x80   :  { %670 = vmatprep.subr.bf16.mxu1 %v2691_v46  ;;  %v722_v46 = vrot.slane %v717_v45, %v3105_v37 }
  0x81   :  { %894 = vmatpush1.bf16.msra.mxu0 %v2700_v53 }
  0x82   :  { %895 = vmatprep.subr.bf16.mxu0 %v2705_v54 }
  0x83   :  { %671 = vmatpush2.bf16.msra.mxu1 %v2693_v47  ;;  %v726_v47 = vrot.slane %v717_v45, %v3099_v13 }
  0x85   :  { %896 = vmatpush1.bf16.msra.mxu0 %v2703_v55 }
  0x86   :  { %897 = vmatprep.subr.bf16.mxu0 %v2708_v56 }
 0x138   :  { %v386_v59 = vpop.f32.mrf.mxu0 }
 0x139   :  { %v387_v60 = vadd.f32 %v386_v59, %v168_v57  ;;  %v2706_v57 = vld [vmem:[#allocation7 + $0x230] ss:$8 sps:$4 sm:$0xff]   ;;  %v2709_v59 = vld [vmem:[#allocation7 + $0x220] ss:$8 sps:$4 sm:$0xff]  }
 0x13a   :  { %v388_v61 = vpop.f32.mrf.mxu0  ;;  %898 = vmatpush1.bf16.msra.mxu0 %v2706_v57 }
 0x13b   :  { %v389_v62 = vadd.f32 %v388_v61, %v172_v58  ;;  %v398_v0 = vsel %vm397_vm1, %v387_v60, 0.0  ;;  %v2711_v58 = vld [vmem:[#allocation7 + $0x224] ss:$8 sps:$4 sm:$0xff]   ;;  %v2712_v61 = vld [vmem:[#allocation7 + $0x210] ss:$8 sps:$4 sm:$0xff]  }
 0x13c   :  { %v390_v63 = vpop.f32.mrf.mxu0  ;;  %899 = vmatprep.subr.bf16.mxu0 %v2711_v58 }
 0x13d   :  { %v399_v1 = vsel %vm397_vm1, %v389_v62, 0.0  ;;  %v2715_v63 = vld [vmem:[#allocation7 + $0x200] ss:$8 sps:$4 sm:$0xff]  }
 0x13e   :  { %v391_v2 = vpop.f32.mrf.mxu0  ;;  %v400_v3 = vadd.f32 %v399_v1, %v398_v0  ;;  %900 = vmatpush1.bf16.msra.mxu0 %v2709_v59  ;;  %v2720_v0 = vld [vmem:[#allocation7 + $0x2f4] ss:$8 sps:$4 sm:$0xff]   ;;  %v2718_v1 = vld [vmem:[#allocation7 + $0x2f0] ss:$8 sps:$4 sm:$0xff]  }
 0x13f   :  { %v2723_v2 = vld [vmem:[#allocation7 + $0x2e4] ss:$8 sps:$4 sm:$0xff]  }
 0x140   :  { %401 = vadd.xlane.f32.xlu0 %v400_v3  ;;  %v2721_v3 = vld [vmem:[#allocation7 + $0x2e0] ss:$8 sps:$4 sm:$0xff]  }
 0x1c9   :  { %v402_v25 = vpop.xlane.xlu0 %401 }
 0x1ca   :  { %v404_v26 = vmul.f32 0.00390625, %v402_v25  ;;  %v436_v25 = vrot.slane %v396_v20, %v3105_v37 }
 0x1cc   :  { %v3114_v27 = vsub.f32 %v387_v60, %v404_v26  ;;  %v3116_v28 = vsub.f32 %v389_v62, %v404_v26  ;;  %v2714_v60 = vld [vmem:[#allocation7 + $0x214] ss:$8 sps:$4 sm:$0xff]   ;;  %v2717_v62 = vld [vmem:[#allocation7 + $0x204] ss:$8 sps:$4 sm:$0xff]   ;;  %v440_v26 = vrot.slane %v396_v20, %v3099_v13 }
 0x1cd   :  { %901 = vmatprep.subr.bf16.mxu0 %v2714_v60  ;;  %v75_v60 = vld [vmem:[#allocation2 + $0x20] sm:$0xff]  ;;  %v77_v20 = vld [vmem:[#allocation2 + $0x30] sm:$0xff] }
 0x1ce   :  { %v407_v29 = vmul.f32 %v3114_v27, %v3114_v27  ;;  %v408_v30 = vmul.f32 %v3116_v28, %v3116_v28  ;;  %902 = vmatpush1.bf16.msra.mxu0 %v2712_v61  ;;  %v76_v61 = vld [vmem:[#allocation2 + $0x28] sm:$0xff] }
 0x1cf   :  { %903 = vmatprep.subr.bf16.mxu0 %v2717_v62 }
 0x1d0   :  { %v409_v31 = vsel %vm397_vm1, %v407_v29, 0.0  ;;  %v410_v32 = vsel %vm397_vm1, %v408_v30, 0.0 }
 0x1d1   :  { %v411_v33 = vadd.f32 %v410_v32, %v409_v31 }
 0x1d2   :  { %904 = vmatpush1.bf16.msra.mxu0 %v2715_v63 }
 0x1d3   :  { %412 = vadd.xlane.f32.xlu0 %v411_v33  ;;  %905 = vmatprep.subr.bf16.mxu0 %v2720_v0  ;;  %v71_v0 = vld [vmem:[#allocation2] sm:$0xff] }
 0x1d6   :  { %906 = vmatpush2.bf16.msra.mxu0 %v2718_v1  ;;  %v72_v1 = vld [vmem:[#allocation2 + $0x8] sm:$0xff] }
 0x1d7   :  { %907 = vmatprep.subr.bf16.mxu0 %v2723_v2  ;;  %v79_v2 = vld [vmem:[#allocation2 + $0x40] sm:$0xff] }
 0x1da   :  { %908 = vmatpush2.bf16.msra.mxu0 %v2721_v3  ;;  %v80_v3 = vld [vmem:[#allocation2 + $0x48] sm:$0xff] }
 0x1db   :  { %909 = vmatprep.subr.bf16.mxu0 %v2726_v4 }
 0x1de   :  { %910 = vmatpush2.bf16.msra.mxu0 %v2724_v5 }
 0x1df   :  { %911 = vmatprep.subr.bf16.mxu0 %v2729_v6  ;;  %v74_v6 = vld [vmem:[#allocation2 + $0x18] sm:$0xff] }
 0x1e2   :  { %912 = vmatpush2.bf16.msra.mxu0 %v2727_v7 }
 0x1e3   :  { %913 = vmatprep.subr.bf16.mxu0 %v2732_v8 }
 0x1e6   :  { %914 = vmatpush2.bf16.msra.mxu0 %v2730_v9 }
 0x1e7   :  { %915 = vmatprep.subr.bf16.mxu0 %v2735_v11 }
 0x1ea   :  { %916 = vmatpush2.bf16.msra.mxu0 %v2733_v12 }
 0x1eb   :  { %917 = vmatprep.subr.bf16.mxu0 %v2738_v14 }
 0x1ee   :  { %918 = vmatpush2.bf16.msra.mxu0 %v2736_v15 }
 0x1ef   :  { %919 = vmatprep.subr.bf16.mxu0 %v2741_v36 }
 0x1f2   :  { %920 = vmatpush2.bf16.msra.mxu0 %v2739_v38 }
 0x25c   :  { %v413_v16 = vpop.xlane.xlu0 %412 }
 0x25d   :  { %v414_v17 = vmul.f32 0.00390625, %v413_v16 }
 0x25f   :  { %v415_v18 = vadd.f32 1e-05, %v414_v17 }
 0x261   :  { %2838 = vrsqrt.f32 %v415_v18  ;;  %v83_v18 = vld [vmem:[#allocation2 + $0x60] sm:$0xff] }
 0x26e   :  { %v2839_v23 = vpop.eup %2838 }
 0x26f   :  { %v418_v24 = vmul.f32 %v2839_v23, %v3116_v28  ;;  %v417_v29 = vmul.f32 %v2839_v23, %v3114_v27  ;;  %v3054_v27 = vmov 1966171168  }
 0x270   :  { %v934_v44 = vunpack.c.l.s4 %v3054_v27  ;;  %v85_v27 = vld [vmem:[#allocation2 + $0x70] sm:$0xff] }
 0x271   :  { %v431_v30 = vmul.f32 %v427_v22, %v418_v24  ;;  %v430_v31 = vmul.f32 %v423_v21, %v417_v29  ;;  %v78_v21 = vld [vmem:[#allocation2 + $0x38] sm:$0xff] }
 0x272   :  { %v935_v48 = vunpack.c.0.s8 %v934_v44  ;;  %v86_v44 = vld [vmem:[#allocation2 + $0x78] sm:$0xff] }
 0x273   :  { %v444_v32 = vadd.f32 %v440_v26, %v431_v30  ;;  %v443_v33 = vadd.f32 %v436_v25, %v430_v31 }
 0x274   :  { %v938_v53 = vsub.s32 %v935_v48, %v3096_v10  ;;  %v73_v10 = vld [vmem:[#allocation2 + $0x10] sm:$0xff] }
 0x275   :  { %v479_v34 = vpack.c.bf16 %v444_v32, %v444_v32  ;;  %v478_v35 = vpack.c.bf16 %v443_v33, %v443_v33  ;;  %v87_v32 = vld [vmem:[#allocation2 + $0x80] sm:$0xff]  ;;  %v88_v33 = vld [vmem:[#allocation2 + $0x88] sm:$0xff] }
 0x277   :  { %672 = vmatprep.mubr.bf16.mxu1 %v479_v34  ;;  %v81_v34 = vld [vmem:[#allocation2 + $0x50] sm:$0xff] }
 0x278   :  { %673 = vmatmul.mubr.bf16.vlgmr.msra.gmra.mxu1 %v478_v35  ;;  %v82_v35 = vld [vmem:[#allocation2 + $0x58] sm:$0xff] }
 0x338   :  { %v674_v39 = vpop.f32.mrf.mxu1 }
 0x339   :  { %v714_v41 = vpack.c.bf16 %v674_v39, %v674_v39 }
 0x33a   :  { %v676_v28 = vpop.f32.mrf.mxu1 }
 0x33b   :  { %v715_v40 = vpack.c.bf16 %v676_v28, %v676_v28 }
 0x33c   :  { %v678_v42 = vpop.f32.mrf.mxu1 }
 0x33d   :  { %921 = vmatprep.mubr.bf16.mxu0 %v715_v40  ;;  %v91_v42 = vld [vmem:[#allocation2 + $0xa0] sm:$0xff] }
 0x33e   :  { %v679_v43 = vpop.f32.mrf.mxu1  ;;  %922 = vmatmul.mubr.bf16.vlgmr.msra.gmra.mxu0 %v714_v41 }
 0x33f   :  { %v92_v43 = vld [vmem:[#allocation2 + $0xa8] sm:$0xff] }
 0x3fe   :  { %v923_v49 = vpop.f32.mrf.mxu0 }
 0x3ff   :  { %v924_v51 = vadd.f32 %v923_v49, %v722_v46 }
 0x400   :  { %v925_v50 = vpop.f32.mrf.mxu0 }
 0x401   :  { %v926_v52 = vadd.f32 %v925_v50, %v726_v47 }
 0x402   :  { %v927_v54 = vpop.f32.mrf.mxu0 }
 0x403   :  { %v932_v55 = vcombine.low %v924_v51, %v926_v52  ;;  %v95_v51 = vld [vmem:[#allocation2 + $0xc0] sm:$0xff]  ;;  %v96_v52 = vld [vmem:[#allocation2 + $0xc8] sm:$0xff]  ;;  %v90_v54 = vld [vmem:[#allocation2 + $0x98] sm:$0xff] }
 0x404   :  { %v928_v56 = vpop.f32.mrf.mxu0 }
 0x405   :  { %v939_v57 = vrot.slane %v932_v55, %v938_v53 }
 0x407   :  { %v947_v58 = vrot.slane %v939_v57, %v938_v53  ;;  %v940_v59 = vcombine.high %v939_v57, %v939_v57 }
 0x409   :  { %v958_v62 = vrot.slane %v947_v58, %v3105_v37  ;;  %v962_v63 = vrot.slane %v947_v58, %v3099_v13  ;;  %v954_v7 = vrot.slane %v940_v59, %v938_v53  ;;  %v89_v53 = vld [vmem:[#allocation2 + $0x90] sm:$0xff] }
 0x40b   :  { %v3135_v4 = vadd.f32 %v958_v62, %v75_v60  ;;  %v3137_v5 = vadd.f32 %v962_v63, %v76_v61  ;;  %v3139_v8 = vadd.f32 %v958_v62, %v71_v0  ;;  %v3141_v9 = vadd.f32 %v962_v63, %v72_v1  ;;  %v99_v61 = vld [vmem:[#allocation2 + $0xe0] sm:$0xff]  ;;  %v94_v0 = vld [vmem:[#allocation2 + $0xb8] sm:$0xff] }
 0x40c   :  { %v3145_v12 = vadd.f32 %v958_v62, %v79_v2  ;;  %v3147_v14 = vadd.f32 %v962_v63, %v80_v3  ;;  %v3151_v16 = vadd.f32 %v958_v62, %v73_v10  ;;  %v3153_v17 = vadd.f32 %v962_v63, %v74_v6 }
 0x40d   :  { %3974 = vst [vmem:[#allocation17_spill] sm:$0xff] %v3135_v4  ;;  %3975 = vst [vmem:[#allocation18_spill] sm:$0xff] %v3137_v5  ;;  %v1017_v11 = vadd.f32 %v3137_v5, %v3135_v4  ;;  %v1011_v15 = vadd.f32 %v3141_v9, %v3139_v8  ;;  %v3156_v22 = vrot.slane %v954_v7, %v3105_v37 }
 0x40e   :  { %3976 = vst [vmem:[#allocation19_spill] sm:$0xff] %v3139_v8  ;;  %3977 = vst [vmem:[#allocation20_spill] sm:$0xff] %v3141_v9  ;;  %v3159_v23 = vrot.slane %v954_v7, %v3099_v13  ;;  %v1023_v24 = vadd.f32 %v3147_v14, %v3145_v12  ;;  %v3163_v25 = vadd.f32 %v958_v62, %v83_v18 }
 0x40f   :  { %3978 = vst [vmem:[#allocation21_spill] sm:$0xff] %v3145_v12  ;;  %3979 = vst [vmem:[#allocation22_spill] sm:$0xff] %v3147_v14  ;;  %1018 = vadd.xlane.f32.xlu0 %v1017_v11  ;;  %1012 = vadd.xlane.f32.xlu1 %v1011_v15  ;;  %v3165_v26 = vadd.f32 %v962_v63, %v84_v19  ;;  %v1014_v29 = vadd.f32 %v3153_v17, %v3151_v16  ;;  %v97_v11 = vld [vmem:[#allocation2 + $0xd0] sm:$0xff]  ;;  %v98_v15 = vld [vmem:[#allocation2 + $0xd8] sm:$0xff] }
 0x410   :  { %3980 = vst [vmem:[#allocation23_spill] sm:$0xff] %v3151_v16  ;;  %3981 = vst [vmem:[#allocation24_spill] sm:$0xff] %v3153_v17  ;;  %v3169_v30 = vadd.f32 %v958_v62, %v77_v20  ;;  %v3171_v31 = vadd.f32 %v962_v63, %v78_v21  ;;  %v3176_v38 = vadd.f32 %v3156_v22, %v87_v32 }
 0x411   :  { %3982 = vst [vmem:[#allocation25_spill] sm:$0xff] %v3163_v25  ;;  %3983 = vst [vmem:[#allocation26_spill] sm:$0xff] %v3165_v26  ;;  %v1029_v36 = vadd.f32 %v3165_v26, %v3163_v25  ;;  %v3179_v39 = vadd.f32 %v3159_v23, %v88_v33  ;;  %v3183_v40 = vadd.f32 %v958_v62, %v81_v34 }
 0x412   :  { %3984 = vst [vmem:[#allocation27_spill] sm:$0xff] %v3169_v30  ;;  %3985 = vst [vmem:[#allocation28_spill] sm:$0xff] %v3171_v31  ;;  %v1020_v28 = vadd.f32 %v3171_v31, %v3169_v30  ;;  %v3185_v41 = vadd.f32 %v962_v63, %v82_v35  ;;  %v3190_v46 = vadd.f32 %v3156_v22, %v91_v42  ;;  %v2747_v42 = vld [vmem:[#allocation7 + $0x364] ss:$8 sps:$4 sm:$0xff]  }
 0x413   :  { %1024 = vadd.xlane.f32.xlu0 %v1023_v24  ;;  %1015 = vadd.xlane.f32.xlu1 %v1014_v29  ;;  %3986 = vst [vmem:[#allocation29_spill] sm:$0xff] %v3176_v38  ;;  %3987 = vst [vmem:[#allocation30_spill] sm:$0xff] %v3179_v39  ;;  %v1035_v45 = vadd.f32 %v3179_v39, %v3176_v38  ;;  %v3193_v47 = vadd.f32 %v3159_v23, %v92_v43  ;;  %v101_v24 = vld [vmem:[#allocation2 + $0xf0] sm:$0xff]  ;;  %v102_v29 = vld [vmem:[#allocation2 + $0xf8] sm:$0xff] }
 0x414   :  { %3988 = vst [vmem:[#allocation31_spill] sm:$0xff] %v3183_v40  ;;  %3989 = vst [vmem:[#allocation32_spill] sm:$0xff] %v3185_v41  ;;  %v1026_v48 = vadd.f32 %v3185_v41, %v3183_v40  ;;  %v3197_v49 = vadd.f32 %v958_v62, %v85_v27  ;;  %v3199_v50 = vadd.f32 %v962_v63, %v86_v44  ;;  %v100_v62 = vld [vmem:[#allocation2 + $0xe8] sm:$0xff]  ;;  %v93_v63 = vld [vmem:[#allocation2 + $0xb0] sm:$0xff] }
 0x415   :  { %3990 = vst [vmem:[#allocation33_spill] sm:$0xff] %v3190_v46  ;;  %3991 = vst [vmem:[#allocation34_spill] sm:$0xff] %v3193_v47  ;;  %v1041_v55 = vadd.f32 %v3193_v47, %v3190_v46  ;;  %v3204_v56 = vadd.f32 %v3156_v22, %v95_v51  ;;  %v3207_v57 = vadd.f32 %v3159_v23, %v96_v52  ;;  %v2745_v43 = vld [vmem:[#allocation7 + $0x360] ss:$8 sps:$4 sm:$0xff]   ;;  %v2750_v27 = vld [vmem:[#allocation7 + $0x354] ss:$8 sps:$4 sm:$0xff]  }
 0x416   :  { %3992 = vst [vmem:[#allocation35_spill] sm:$0xff] %v3197_v49  ;;  %3993 = vst [vmem:[#allocation36_spill] sm:$0xff] %v3199_v50  ;;  %v1032_v58 = vadd.f32 %v3199_v50, %v3197_v49  ;;  %v3212_v59 = vadd.f32 %v3156_v22, %v89_v53  ;;  %v3215_v60 = vadd.f32 %v3159_v23, %v90_v54  ;;  %v2748_v44 = vld [vmem:[#allocation7 + $0x350] ss:$8 sps:$4 sm:$0xff]   ;;  %v2759_v51 = vld [vmem:[#allocation7 + $0x324] ss:$8 sps:$4 sm:$0xff]  }
 0x417   :  { %1030 = vadd.xlane.f32.xlu0 %v1029_v36  ;;  %1021 = vadd.xlane.f32.xlu1 %v1020_v28  ;;  %3994 = vst [vmem:[#allocation37_spill] sm:$0xff] %v3204_v56  ;;  %3995 = vst [vmem:[#allocation38_spill] sm:$0xff] %v3207_v57  ;;  %v1047_v1 = vadd.f32 %v3207_v57, %v3204_v56  ;;  %v3220_v2 = vadd.f32 %v3156_v22, %v99_v61  ;;  %v2742_v36 = vld [vmem:[#allocation7 + $0x370] ss:$8 sps:$4 sm:$0xff]   ;;  %v2744_v28 = vld [vmem:[#allocation7 + $0x374] ss:$8 sps:$4 sm:$0xff]  }
 0x418   :  { %3996 = vst [vmem:[#allocation39_spill] sm:$0xff] %v3212_v59  ;;  %3997 = vst [vmem:[#allocation40_spill] sm:$0xff] %v3215_v60  ;;  %v3223_v3 = vadd.f32 %v3159_v23, %v100_v62  ;;  %v1038_v10 = vadd.f32 %v3215_v60, %v3212_v59  ;;  %v3228_v6 = vadd.f32 %v3156_v22, %v93_v63  ;;  %1575 = vmatprep.subr.bf16.mxu1 %v2744_v28  ;;  %v2757_v52 = vld [vmem:[#allocation7 + $0x320] ss:$8 sps:$4 sm:$0xff]   ;;  %v2762_v53 = vld [vmem:[#allocation7 + $0x314] ss:$8 sps:$4 sm:$0xff]  }
 0x419   :  { %3998 = vst [vmem:[#allocation41_spill] sm:$0xff] %v3220_v2  ;;  %v3231_v7 = vadd.f32 %v3159_v23, %v94_v0  ;;  %v3238_v20 = vadd.f32 %v3156_v22, %v97_v11  ;;  %v3241_v21 = vadd.f32 %v3159_v23, %v98_v15  ;;  %v3246_v33 = vadd.f32 %v3156_v22, %v101_v24  ;;  %v2753_v22 = vld [vmem:[#allocation7 + $0x344] ss:$8 sps:$4 sm:$0xff]   ;;  %v2760_v54 = vld [vmem:[#allocation7 + $0x310] ss:$8 sps:$4 sm:$0xff]  }
 0x41a   :  { %3999 = vst [vmem:[#allocation42_spill] sm:$0xff] %v3223_v3  ;;  %4000 = vst [vmem:[#allocation43_spill] sm:$0xff] %v3228_v6  ;;  %v1053_v18 = vadd.f32 %v3223_v3, %v3220_v2  ;;  %v3249_v34 = vadd.f32 %v3159_v23, %v102_v29  ;;  %1576 = vmatpush1.bf16.msra.mxu1 %v2742_v36  ;;  %v2751_v23 = vld [vmem:[#allocation7 + $0x340] ss:$8 sps:$4 sm:$0xff]   ;;  %v2768_v61 = vld [vmem:[#allocation7 + $0x3f4] ss:$8 sps:$4 sm:$0xff]  }
 0x41b   :  { %1036 = vadd.xlane.f32.xlu0 %v1035_v45  ;;  %1027 = vadd.xlane.f32.xlu1 %v1026_v48  ;;  %4001 = vst [vmem:[#allocation44_spill] sm:$0xff] %v3231_v7  ;;  %v1044_v19 = vadd.f32 %v3231_v7, %v3228_v6  ;;  %4002 = vst [vmem:[#allocation45_spill] sm:$0xff] %v3238_v20  ;;  %v1050_v32 = vadd.f32 %v3241_v21, %v3238_v20  ;;  %v2756_v45 = vld [vmem:[#allocation7 + $0x334] ss:$8 sps:$4 sm:$0xff]   ;;  %v2754_v48 = vld [vmem:[#allocation7 + $0x330] ss:$8 sps:$4 sm:$0xff]  }
 0x41c   :  { %4003 = vst [vmem:[#allocation46_spill] sm:$0xff] %v3241_v21  ;;  %4004 = vst [vmem:[#allocation47_spill] sm:$0xff] %v3246_v33  ;;  %v1056_v35 = vadd.f32 %v3249_v34, %v3246_v33  ;;  %1577 = vmatprep.subr.bf16.mxu1 %v2747_v42  ;;  %v2766_v62 = vld [vmem:[#allocation7 + $0x3f0] ss:$8 sps:$4 sm:$0xff]  }
 0x41d   :  { %4005 = vst [vmem:[#allocation48_spill] sm:$0xff] %v3249_v34 }
 0x41e   :  { %1578 = vmatpush1.bf16.msra.mxu1 %v2745_v43 }
 0x41f   :  { %1042 = vadd.xlane.f32.xlu0 %v1041_v55  ;;  %1033 = vadd.xlane.f32.xlu1 %v1032_v58  ;;  %v2765_v55 = vld [vmem:[#allocation7 + $0x304] ss:$8 sps:$4 sm:$0xff]   ;;  %v2763_v58 = vld [vmem:[#allocation7 + $0x300] ss:$8 sps:$4 sm:$0xff]  }
 0x420   :  { %1579 = vmatprep.subr.bf16.mxu1 %v2750_v27 }
 0x422   :  { %1580 = vmatpush1.bf16.msra.mxu1 %v2748_v44 }
 0x423   :  { %1048 = vadd.xlane.f32.xlu0 %v1047_v1  ;;  %1039 = vadd.xlane.f32.xlu1 %v1038_v10 }
 0x424   :  { %1581 = vmatprep.subr.bf16.mxu1 %v2753_v22 }
 0x426   :  { %1582 = vmatpush1.bf16.msra.mxu1 %v2751_v23 }
 0x427   :  { %1054 = vadd.xlane.f32.xlu0 %v1053_v18  ;;  %1045 = vadd.xlane.f32.xlu1 %v1044_v19 }
 0x428   :  { %1583 = vmatprep.subr.bf16.mxu1 %v2756_v45 }
 0x42a   :  { %1584 = vmatpush1.bf16.msra.mxu1 %v2754_v48 }
 0x42b   :  { %1051 = vadd.xlane.f32.xlu1 %v1050_v32  ;;  %1585 = vmatprep.subr.bf16.mxu1 %v2759_v51 }
 0x42e   :  { %1586 = vmatpush1.bf16.msra.mxu1 %v2757_v52 }
 0x42f   :  { %1057 = vadd.xlane.f32.xlu1 %v1056_v35  ;;  %1587 = vmatprep.subr.bf16.mxu1 %v2762_v53 }
 0x432   :  { %1588 = vmatpush1.bf16.msra.mxu1 %v2760_v54 }
 0x433   :  { %1589 = vmatprep.subr.bf16.mxu1 %v2765_v55 }
 0x436   :  { %1590 = vmatpush1.bf16.msra.mxu1 %v2763_v58 }
 0x437   :  { %1591 = vmatprep.subr.bf16.mxu1 %v2768_v61 }
 0x43a   :  { %1592 = vmatpush2.bf16.msra.mxu1 %v2766_v62 }
 0x498   :  { %v1019_v63 = vpop.xlane.xlu0 %1018  ;;  %v1013_v1 = vpop.xlane.xlu1 %1012 }
 0x499   :  { %v1061_v0 = vmul.f32 0.00390625, %v1019_v63  ;;  %v1059_v10 = vmul.f32 0.00390625, %v1013_v1 }
 0x49b   :  { %v3254_v11 = vsub.f32 %v3135_v4, %v1061_v0  ;;  %v3257_v15 = vsub.f32 %v3137_v5, %v1061_v0  ;;  %v3260_v18 = vsub.f32 %v3139_v8, %v1059_v10  ;;  %v3263_v19 = vsub.f32 %v3141_v9, %v1059_v10 }
 0x49c   :  { %v1025_v24 = vpop.xlane.xlu0 %1024  ;;  %v1016_v32 = vpop.xlane.xlu1 %1015 }
 0x49d   :  { %v1063_v29 = vmul.f32 0.00390625, %v1025_v24  ;;  %v1060_v35 = vmul.f32 0.00390625, %v1016_v32  ;;  %v1107_v36 = vmul.f32 %v3260_v18, %v3260_v18  ;;  %v1108_v28 = vmul.f32 %v3263_v19, %v3263_v19 }
 0x49e   :  { %v1111_v27 = vmul.f32 %v3254_v11, %v3254_v11  ;;  %v1112_v48 = vmul.f32 %v3257_v15, %v3257_v15 }
 0x49f   :  { %v3270_v42 = vsub.f32 %v3145_v12, %v1063_v29  ;;  %v3273_v43 = vsub.f32 %v3147_v14, %v1063_v29  ;;  %v3278_v44 = vsub.f32 %v3151_v16, %v1060_v35  ;;  %v3281_v22 = vsub.f32 %v3153_v17, %v1060_v35 }
 0x4a0   :  { %v1031_v23 = vpop.xlane.xlu0 %1030  ;;  %v1139_v45 = vadd.f32 %v1108_v28, %v1107_v36  ;;  %v1022_v52 = vpop.xlane.xlu1 %1021  ;;  %v1145_v24 = vadd.f32 %v1112_v48, %v1111_v27 }
 0x4a1   :  { %v1065_v51 = vmul.f32 0.00390625, %v1031_v23  ;;  %v1062_v53 = vmul.f32 0.00390625, %v1022_v52  ;;  %v1109_v54 = vmul.f32 %v3278_v44, %v3278_v44  ;;  %v1110_v55 = vmul.f32 %v3281_v22, %v3281_v22 }
 0x4a2   :  { %1140 = vadd.xlane.f32.xlu0 %v1139_v45  ;;  %v1115_v62 = vmul.f32 %v3270_v42, %v3270_v42  ;;  %v1116_v63 = vmul.f32 %v3273_v43, %v3273_v43 }
 0x4a3   :  { %v3290_v58 = vsub.f32 %v3163_v25, %v1065_v51  ;;  %v3293_v61 = vsub.f32 %v3165_v26, %v1065_v51  ;;  %v3300_v0 = vsub.f32 %v3169_v30, %v1062_v53  ;;  %v3303_v1 = vsub.f32 %v3171_v31, %v1062_v53 }
 0x4a4   :  { %v1037_v10 = vpop.xlane.xlu0 %1036  ;;  %v1142_v29 = vadd.f32 %v1110_v55, %v1109_v54  ;;  %v1028_v35 = vpop.xlane.xlu1 %1027  ;;  %v1151_v51 = vadd.f32 %v1116_v63, %v1115_v62 }
 0x4a5   :  { %v1067_v32 = vmul.f32 0.00390625, %v1037_v10  ;;  %v1064_v36 = vmul.f32 0.00390625, %v1028_v35  ;;  %v1113_v28 = vmul.f32 %v3300_v0, %v3300_v0  ;;  %v1114_v23 = vmul.f32 %v3303_v1, %v3303_v1 }
 0x4a6   :  { %1146 = vadd.xlane.f32.xlu0 %v1145_v24  ;;  %1143 = vadd.xlane.f32.xlu1 %v1142_v29  ;;  %v1119_v52 = vmul.f32 %v3290_v58, %v3290_v58  ;;  %v1120_v27 = vmul.f32 %v3293_v61, %v3293_v61 }
 0x4a7   :  { %v3310_v45 = vsub.f32 %v3176_v38, %v1067_v32  ;;  %v3317_v48 = vsub.f32 %v3179_v39, %v1067_v32  ;;  %v3320_v53 = vsub.f32 %v3183_v40, %v1064_v36  ;;  %v3323_v54 = vsub.f32 %v3185_v41, %v1064_v36 }
 0x4a8   :  { %v1043_v55 = vpop.xlane.xlu0 %1042  ;;  %v1148_v10 = vadd.f32 %v1114_v23, %v1113_v28  ;;  %v1034_v29 = vpop.xlane.xlu1 %1033  ;;  %v1157_v36 = vadd.f32 %v1120_v27, %v1119_v52 }
 0x4a9   :  { %v1069_v24 = vmul.f32 0.00390625, %v1043_v55  ;;  %v1066_v62 = vmul.f32 0.00390625, %v1034_v29  ;;  %v1117_v63 = vmul.f32 %v3320_v53, %v3320_v53  ;;  %v1118_v32 = vmul.f32 %v3323_v54, %v3323_v54 }
 0x4aa   :  { %1152 = vadd.xlane.f32.xlu0 %v1151_v51  ;;  %1149 = vadd.xlane.f32.xlu1 %v1148_v10  ;;  %v1123_v28 = vmul.f32 %v3310_v45, %v3310_v45  ;;  %v1124_v29 = vmul.f32 %v3317_v48, %v3317_v48 }
 0x4ab   :  { %v3330_v35 = vsub.f32 %v3190_v46, %v1069_v24  ;;  %v3333_v39 = vsub.f32 %v3193_v47, %v1069_v24  ;;  %v3338_v23 = vsub.f32 %v3197_v49, %v1066_v62  ;;  %v3341_v51 = vsub.f32 %v3199_v50, %v1066_v62  ;;  %v2771_v50 = vld [vmem:[#allocation7 + $0x3e4] ss:$8 sps:$4 sm:$0xff]  }
 0x4ac   :  { %v1049_v55 = vpop.xlane.xlu0 %1048  ;;  %v1154_v10 = vadd.f32 %v1118_v32, %v1117_v63  ;;  %v1040_v38 = vpop.xlane.xlu1 %1039  ;;  %1593 = vmatprep.subr.bf16.mxu1 %v2771_v50 }
 0x4ad   :  { %v1071_v46 = vmul.f32 0.00390625, %v1049_v55  ;;  %v1068_v26 = vmul.f32 0.00390625, %v1040_v38  ;;  %v1121_v52 = vmul.f32 %v3338_v23, %v3338_v23  ;;  %v1122_v27 = vmul.f32 %v3341_v51, %v3341_v51 }
 0x4ae   :  { %1158 = vadd.xlane.f32.xlu0 %v1157_v36  ;;  %1155 = vadd.xlane.f32.xlu1 %v1154_v10  ;;  %v1127_v63 = vmul.f32 %v3330_v35, %v3330_v35  ;;  %v1128_v38 = vmul.f32 %v3333_v39, %v3333_v39  ;;  %v1163_v10 = vadd.f32 %v1124_v29, %v1123_v28 }
 0x4af   :  { %v3350_v24 = vsub.f32 %v3204_v56, %v1071_v46  ;;  %v3353_v62 = vsub.f32 %v3207_v57, %v1071_v46  ;;  %v3360_v32 = vsub.f32 %v3212_v59, %v1068_v26  ;;  %v3363_v36 = vsub.f32 %v3215_v60, %v1068_v26  ;;  %v2769_v56 = vld [vmem:[#allocation7 + $0x3e0] ss:$8 sps:$4 sm:$0xff]  }
 0x4b0   :  { %v1055_v55 = vpop.xlane.xlu0 %1054  ;;  %v1160_v47 = vadd.f32 %v1122_v27, %v1121_v52  ;;  %v1046_v46 = vpop.xlane.xlu1 %1045  ;;  %v1169_v26 = vadd.f32 %v1128_v38, %v1127_v63  ;;  %1594 = vmatpush2.bf16.msra.mxu1 %v2769_v56  ;;  %v2772_v63 = vld [vmem:[#allocation7 + $0x3d0] ss:$8 sps:$4 sm:$0xff]   ;;  %v2774_v38 = vld [vmem:[#allocation7 + $0x3d4] ss:$8 sps:$4 sm:$0xff]  }
 0x4b1   :  { %v1073_v49 = vmul.f32 0.00390625, %v1055_v55  ;;  %v1070_v57 = vmul.f32 0.00390625, %v1046_v46  ;;  %v1125_v25 = vmul.f32 %v3360_v32, %v3360_v32  ;;  %v1126_v59 = vmul.f32 %v3363_v36, %v3363_v36  ;;  %1595 = vmatprep.subr.bf16.mxu1 %v2774_v38 }
 0x4b2   :  { %1164 = vadd.xlane.f32.xlu0 %v1163_v10  ;;  %1161 = vadd.xlane.f32.xlu1 %v1160_v47  ;;  %v1131_v28 = vmul.f32 %v3350_v24, %v3350_v24  ;;  %v1132_v29 = vmul.f32 %v3353_v62, %v3353_v62 }
 0x4b3   :  { %v3370_v41 = vsub.f32 %v3220_v2, %v1073_v49  ;;  %v3377_v52 = vsub.f32 %v3223_v3, %v1073_v49  ;;  %v3380_v47 = vsub.f32 %v3228_v6, %v1070_v57  ;;  %v3383_v27 = vsub.f32 %v3231_v7, %v1070_v57 }
 0x4b4   :  { %v1166_v55 = vadd.f32 %v1126_v59, %v1125_v25  ;;  %v1052_v10 = vpop.xlane.xlu1 %1051  ;;  %v1175_v3 = vadd.f32 %v1132_v29, %v1131_v28  ;;  %1596 = vmatpush2.bf16.msra.mxu1 %v2772_v63 }
 0x4b5   :  { %4006 = vst [vmem:[#allocation49_spill] sm:$0xff] %v3370_v41  ;;  %v1072_v46 = vmul.f32 0.00390625, %v1052_v10  ;;  %v1129_v50 = vmul.f32 %v3380_v47, %v3380_v47  ;;  %v1130_v49 = vmul.f32 %v3383_v27, %v3383_v27  ;;  %v1135_v2 = vmul.f32 %v3370_v41, %v3370_v41  ;;  %v2777_v10 = vld [vmem:[#allocation7 + $0x3c4] ss:$8 sps:$4 sm:$0xff]  }
 0x4b6   :  { %1170 = vadd.xlane.f32.xlu0 %v1169_v26  ;;  %1167 = vadd.xlane.f32.xlu1 %v1166_v55  ;;  %v1136_v59 = vmul.f32 %v3377_v52, %v3377_v52  ;;  %v2775_v55 = vld [vmem:[#allocation7 + $0x3c0] ss:$8 sps:$4 sm:$0xff]  }
 0x4b7   :  { %v3392_v25 = vsub.f32 %v3238_v20, %v1072_v46  ;;  %v3395_v56 = vsub.f32 %v3241_v21, %v1072_v46  ;;  %v1172_v57 = vadd.f32 %v1130_v49, %v1129_v50  ;;  %1597 = vmatprep.subr.bf16.mxu1 %v2777_v10  ;;  %v2778_v49 = vld [vmem:[#allocation7 + $0x3b0] ss:$8 sps:$4 sm:$0xff]   ;;  %v2783_v21 = vld [vmem:[#allocation7 + $0x3a4] ss:$8 sps:$4 sm:$0xff]  }
 0x4b8   :  { %v1058_v26 = vpop.xlane.xlu1 %1057  ;;  %v1181_v63 = vadd.f32 %v1136_v59, %v1135_v2  ;;  %1598 = vmatpush2.bf16.msra.mxu1 %v2775_v55  ;;  %v2784_v2 = vld [vmem:[#allocation7 + $0x390] ss:$8 sps:$4 sm:$0xff]   ;;  %v2787_v59 = vld [vmem:[#allocation7 + $0x380] ss:$8 sps:$4 sm:$0xff]   ;;  %v2789_v55 = vld [vmem:[#allocation7 + $0x384] ss:$8 sps:$4 sm:$0xff]  }
 0x4b9   :  { %v1074_v7 = vmul.f32 0.00390625, %v1058_v26  ;;  %v1133_v28 = vmul.f32 %v3392_v25, %v3392_v25  ;;  %v1134_v29 = vmul.f32 %v3395_v56, %v3395_v56  ;;  %v2780_v26 = vld [vmem:[#allocation7 + $0x3b4] ss:$8 sps:$4 sm:$0xff]  }
 0x4ba   :  { %1176 = vadd.xlane.f32.xlu0 %v1175_v3  ;;  %1173 = vadd.xlane.f32.xlu1 %v1172_v57 }
 0x4bb   :  { %v3404_v38 = vsub.f32 %v3246_v33, %v1074_v7  ;;  %v3407_v46 = vsub.f32 %v3249_v34, %v1074_v7  ;;  %v1178_v50 = vadd.f32 %v1134_v29, %v1133_v28  ;;  %1599 = vmatprep.subr.bf16.mxu1 %v2780_v26  ;;  %v2781_v33 = vld [vmem:[#allocation7 + $0x3a0] ss:$8 sps:$4 sm:$0xff]   ;;  %v2786_v7 = vld [vmem:[#allocation7 + $0x394] ss:$8 sps:$4 sm:$0xff]   ;;  %v3413_v28 = vld [vmem:[#allocation7 + $0x470] ss:$8 sps:$4 sm:$0xff]  }
 0x4bc   :  { %1600 = vmatpush2.bf16.msra.mxu1 %v2778_v49  ;;  %v2792_v29 = vld [vmem:[#allocation7 + $0x474] ss:$8 sps:$4 sm:$0xff]   ;;  %v3427_v49 = vld [vmem:[#allocation7 + $0x444] ss:$8 sps:$4 sm:$0xff]   ;;  %v3430_v26 = vld [vmem:[#allocation7 + $0x440] ss:$8 sps:$4 sm:$0xff]  }
 0x4bd   :  { %v1137_v3 = vmul.f32 %v3404_v38, %v3404_v38  ;;  %v1138_v57 = vmul.f32 %v3407_v46, %v3407_v46  ;;  %1601 = vmatprep.subr.bf16.mxu1 %v2783_v21  ;;  %2198 = vmatprep.subr.bf16.mxu0 %v2792_v29  ;;  %v3421_v21 = vld [vmem:[#allocation7 + $0x454] ss:$8 sps:$4 sm:$0xff]  }
 0x4be   :  { %1182 = vadd.xlane.f32.xlu0 %v1181_v63  ;;  %1179 = vadd.xlane.f32.xlu1 %v1178_v50  ;;  %v3415_v63 = vld [vmem:[#allocation7 + $0x464] ss:$8 sps:$4 sm:$0xff]   ;;  %v3418_v50 = vld [vmem:[#allocation7 + $0x460] ss:$8 sps:$4 sm:$0xff]  }
 0x4bf   :  { %v1184_v10 = vadd.f32 %v1138_v57, %v1137_v3  ;;  %2199 = vmatpush1.bf16.msra.mxu0 %v3413_v28  ;;  %v3433_v3 = vld [vmem:[#allocation7 + $0x434] ss:$8 sps:$4 sm:$0xff]   ;;  %v3436_v57 = vld [vmem:[#allocation7 + $0x430] ss:$8 sps:$4 sm:$0xff]  }
 0x4c0   :  { %1602 = vmatpush2.bf16.msra.mxu1 %v2781_v33  ;;  %2200 = vmatprep.subr.bf16.mxu0 %v3415_v63  ;;  %v3424_v33 = vld [vmem:[#allocation7 + $0x450] ss:$8 sps:$4 sm:$0xff]  }
 0x4c1   :  { %1603 = vmatprep.subr.bf16.mxu1 %v2786_v7 }
 0x4c2   :  { %1185 = vadd.xlane.f32.xlu1 %v1184_v10  ;;  %v3439_v10 = vld [vmem:[#allocation7 + $0x424] ss:$8 sps:$4 sm:$0xff]  }
 0x4c3   :  { %2201 = vmatpush1.bf16.msra.mxu0 %v3418_v50 }
 0x4c4   :  { %1604 = vmatpush2.bf16.msra.mxu1 %v2784_v2  ;;  %2202 = vmatprep.subr.bf16.mxu0 %v3421_v21  ;;  %v3442_v2 = vld [vmem:[#allocation7 + $0x420] ss:$8 sps:$4 sm:$0xff]  }
 0x4c5   :  { %1605 = vmatprep.subr.bf16.mxu1 %v2789_v55 }
 0x4c7   :  { %2203 = vmatpush1.bf16.msra.mxu0 %v3424_v33 }
 0x4c8   :  { %1606 = vmatpush2.bf16.msra.mxu1 %v2787_v59  ;;  %2204 = vmatprep.subr.bf16.mxu0 %v3427_v49 }
 0x4c9   :  { %2554 = vmatprep.subr.bf16.mxu1 %v2792_v29 }
 0x4cb   :  { %2205 = vmatpush1.bf16.msra.mxu0 %v3430_v26 }
 0x4cc   :  { %2206 = vmatprep.subr.bf16.mxu0 %v3433_v3 }
 0x4cf   :  { %2207 = vmatpush1.bf16.msra.mxu0 %v3436_v57 }
 0x4d0   :  { %2208 = vmatprep.subr.bf16.mxu0 %v3439_v10 }
 0x4d3   :  { %2209 = vmatpush1.bf16.msra.mxu0 %v3442_v2 }
 0x52b   :  { %v1141_v7 = vpop.xlane.xlu0 %1140 }
 0x52c   :  { %v1187_v59 = vmul.f32 0.00390625, %v1141_v7 }
 0x52e   :  { %v1203_v55 = vadd.f32 1e-05, %v1187_v59 }
 0x52f   :  { %v1147_v29 = vpop.xlane.xlu0 %1146  ;;  %v1144_v34 = vpop.xlane.xlu1 %1143 }
 0x530   :  { %2840 = vrsqrt.f32 %v1203_v55  ;;  %v1189_v20 = vmul.f32 0.00390625, %v1147_v29  ;;  %v1188_v6 = vmul.f32 0.00390625, %v1144_v34  ;;  %v1008_v55 = vld [vmem:[#allocation8 + $0x4] ss:$8 sm:$0x3] }
 0x532   :  { %v1205_v60 = vadd.f32 1e-05, %v1189_v20  ;;  %v1204_v40 = vadd.f32 1e-05, %v1188_v6 }
 0x533   :  { %v1153_v14 = vpop.xlane.xlu0 %1152  ;;  %v1150_v12 = vpop.xlane.xlu1 %1149 }
 0x534   :  { %2842 = vrsqrt.f32 %v1205_v60  ;;  %v1191_v31 = vmul.f32 0.00390625, %v1153_v14  ;;  %v1190_v30 = vmul.f32 0.00390625, %v1150_v12  ;;  %v3447_v14 = vrot.slane %v1008_v55, %v3099_v13 }
 0x535   :  { %2844 = vrsqrt.f32 %v1204_v40 }
 0x536   :  { %v1207_v5 = vadd.f32 1e-05, %v1191_v31  ;;  %v1206_v4 = vadd.f32 1e-05, %v1190_v30 }
 0x537   :  { %v1159_v17 = vpop.xlane.xlu0 %1158  ;;  %v1156_v16 = vpop.xlane.xlu1 %1155  ;;  %v1010_v31 = vld [vmem:[#allocation8 + $0x5] ss:$8 sm:$0x3] }
 0x538   :  { %2846 = vrsqrt.f32 %v1207_v5  ;;  %v1193_v7 = vmul.f32 0.00390625, %v1159_v17  ;;  %v1192_v59 = vmul.f32 0.00390625, %v1156_v16  ;;  %v3451_v5 = vrot.slane %v1008_v55, %v3105_v37 }
 0x539   :  { %2848 = vrsqrt.f32 %v1206_v4 }
 0x53a   :  { %v1208_v9 = vadd.f32 1e-05, %v1192_v59  ;;  %v1209_v34 = vadd.f32 1e-05, %v1193_v7  ;;  %v3456_v7 = vrot.slane %v1010_v31, %v3099_v13 }
 0x53b   :  { %v1162_v29 = vpop.xlane.xlu1 %1161  ;;  %v1165_v8 = vpop.xlane.xlu0 %1164 }
 0x53c   :  { %v1194_v20 = vmul.f32 0.00390625, %v1162_v29  ;;  %2850 = vrsqrt.f32 %v1208_v9  ;;  %v1195_v17 = vmul.f32 0.00390625, %v1165_v8 }
 0x53d   :  { %v2841_v6 = vpop.eup %2840  ;;  %2852 = vrsqrt.f32 %v1209_v34 }
 0x53e   :  { %v1210_v12 = vadd.f32 1e-05, %v1194_v20  ;;  %v1236_v30 = vmul.f32 %v2841_v6, %v3263_v19  ;;  %v1235_v4 = vmul.f32 %v2841_v6, %v3260_v18  ;;  %v3459_v19 = vrot.slane %v1010_v31, %v3105_v37 }
 0x53f   :  { %v1168_v16 = vpop.xlane.xlu1 %1167  ;;  %v1211_v6 = vadd.f32 1e-05, %v1195_v17 }
 0x540   :  { %v1196_v40 = vmul.f32 0.00390625, %v1168_v16  ;;  %2854 = vrsqrt.f32 %v1210_v12  ;;  %v1279_v9 = vmul.f32 %v3447_v14, %v1236_v30  ;;  %v1278_v55 = vmul.f32 %v3451_v5, %v1235_v4  ;;  %v1171_v30 = vpop.xlane.xlu0 %1170 }
 0x541   :  { %v2843_v60 = vpop.eup %2842 }
 0x542   :  { %v2845_v59 = vpop.eup %2844  ;;  %v1212_v29 = vadd.f32 1e-05, %v1196_v40  ;;  %v1240_v18 = vmul.f32 %v2843_v60, %v3257_v15  ;;  %v1322_v13 = vadd.f32 %v3456_v7, %v1279_v9  ;;  %v1321_v4 = vadd.f32 %v3459_v19, %v1278_v55 }
 0x543   :  { %v1174_v20 = vpop.xlane.xlu1 %1173  ;;  %v1238_v8 = vmul.f32 %v2845_v59, %v3281_v22  ;;  %v1237_v34 = vmul.f32 %v2845_v59, %v3278_v44  ;;  %v1239_v9 = vmul.f32 %v2843_v60, %v3254_v11 }
 0x544   :  { %2856 = vrsqrt.f32 %v1212_v29  ;;  %v1198_v37 = vmul.f32 0.00390625, %v1174_v20  ;;  %v1283_v15 = vmul.f32 %v3447_v14, %v1240_v18 }
 0x545   :  { %v2847_v12 = vpop.eup %2846  ;;  %v1281_v16 = vmul.f32 %v3447_v14, %v1238_v8  ;;  %v1280_v40 = vmul.f32 %v3451_v5, %v1237_v34  ;;  %2858 = vrsqrt.f32 %v1211_v6  ;;  %v1197_v8 = vmul.f32 0.00390625, %v1171_v30 }
 0x546   :  { %v2849_v31 = vpop.eup %2848  ;;  %v1244_v55 = vmul.f32 %v2847_v12, %v3273_v43 }
 0x547   :  { %v1324_v22 = vadd.f32 %v3456_v7, %v1281_v16  ;;  %v1323_v44 = vadd.f32 %v3459_v19, %v1280_v40  ;;  %v1242_v17 = vmul.f32 %v2849_v31, %v3303_v1  ;;  %v1241_v59 = vmul.f32 %v2849_v31, %v3300_v0  ;;  %v1180_v6 = vpop.xlane.xlu1 %1179 }
 0x548   :  { %v1214_v16 = vadd.f32 1e-05, %v1198_v37  ;;  %v1326_v40 = vadd.f32 %v3456_v7, %v1283_v15  ;;  %v1213_v60 = vadd.f32 1e-05, %v1197_v8  ;;  %v1287_v43 = vmul.f32 %v3447_v14, %v1244_v55 }
 0x549   :  { %v1387_v34 = vpack.c.bf16 %v1324_v22, %v1322_v13  ;;  %v1386_v41 = vpack.c.bf16 %v1323_v44, %v1321_v4  ;;  %v1285_v29 = vmul.f32 %v3447_v14, %v1242_v17  ;;  %v2851_v20 = vpop.eup %2850  ;;  %v1284_v18 = vmul.f32 %v3451_v5, %v1241_v59  ;;  %v1177_v4 = vpop.xlane.xlu0 %1176 }
 0x54a   :  { %v1246_v0 = vmul.f32 %v2851_v20, %v3323_v54  ;;  %v1282_v13 = vmul.f32 %v3451_v5, %v1239_v9  ;;  %v2853_v11 = vpop.eup %2852  ;;  %v1245_v22 = vmul.f32 %v2851_v20, %v3320_v53  ;;  %2860 = vrsqrt.f32 %v1214_v16 }
 0x54b   :  { %1607 = vmatprep.mubr.bf16.mxu1 %v1387_v34  ;;  %v1328_v1 = vadd.f32 %v3456_v7, %v1285_v29  ;;  %v1327_v15 = vadd.f32 %v3459_v19, %v1284_v18  ;;  %v1243_v59 = vmul.f32 %v2847_v12, %v3270_v42  ;;  %2862 = vrsqrt.f32 %v1213_v60  ;;  %v1186_v20 = vpop.xlane.xlu1 %1185 }
 0x54c   :  { %1608 = vmatmul.mubr.bf16.vlgmr.msra.gmra.mxu1 %v1386_v41  ;;  %v1289_v31 = vmul.f32 %v3447_v14, %v1246_v0  ;;  %v1200_v41 = vmul.f32 0.00390625, %v1180_v6  ;;  %v1325_v17 = vadd.f32 %v3459_v19, %v1282_v13  ;;  %v1330_v8 = vadd.f32 %v3456_v7, %v1287_v43 }
 0x54d   :  { %v1389_v30 = vpack.c.bf16 %v1328_v1, %v1326_v40  ;;  %2570 = vmatpush1.bf16.msra.mxu1 %v3413_v28  ;;  %v2855_v37 = vpop.eup %2854  ;;  %v1199_v28 = vmul.f32 0.00390625, %v1177_v4  ;;  %v1248_v9 = vmul.f32 %v2853_v11, %v3293_v61  ;;  %v1286_v42 = vmul.f32 %v3451_v5, %v1243_v59 }
 0x54e   :  { %2555 = vmatprep.subr.bf16.mxu1 %v3415_v63  ;;  %v1332_v54 = vadd.f32 %v3456_v7, %v1289_v31  ;;  %v1250_v44 = vmul.f32 %v2855_v37, %v3341_v51  ;;  %v1388_v53 = vpack.c.bf16 %v1327_v15, %v1325_v17  ;;  %v1288_v63 = vmul.f32 %v3451_v5, %v1245_v22 }
 0x54f   :  { %1617 = vmatprep.mubr.bf16.mxu1 %v1389_v30  ;;  %v1216_v29 = vadd.f32 1e-05, %v1200_v41  ;;  %v1215_v18 = vadd.f32 1e-05, %v1199_v28  ;;  %v1291_v61 = vmul.f32 %v3447_v14, %v1248_v9  ;;  %v1249_v40 = vmul.f32 %v2855_v37, %v3338_v23 }
 0x550   :  { %v1391_v51 = vpack.c.bf16 %v1332_v54, %v1330_v8  ;;  %v1293_v55 = vmul.f32 %v3447_v14, %v1250_v44  ;;  %v1331_v16 = vadd.f32 %v3459_v19, %v1288_v63  ;;  %v1329_v6 = vadd.f32 %v3459_v19, %v1286_v42 }
 0x551   :  { %2571 = vmatpush1.bf16.msra.mxu1 %v3418_v50  ;;  %v2857_v34 = vpop.eup %2856  ;;  %v1183_v50 = vpop.xlane.xlu0 %1182  ;;  %2864 = vrsqrt.f32 %v1216_v29  ;;  %v1247_v13 = vmul.f32 %v2853_v11, %v3290_v58  ;;  %v1334_v30 = vadd.f32 %v3456_v7, %v1291_v61 }
 0x552   :  { %2556 = vmatprep.subr.bf16.mxu1 %v3421_v21  ;;  %v2859_v12 = vpop.eup %2858  ;;  %v1202_v21 = vmul.f32 0.00390625, %v1186_v20  ;;  %v1336_v1 = vadd.f32 %v3456_v7, %v1293_v55  ;;  %v1254_v0 = vmul.f32 %v2857_v34, %v3363_v36  ;;  %2866 = vrsqrt.f32 %v1215_v18 }
 0x553   :  { %v1201_v60 = vmul.f32 0.00390625, %v1183_v50  ;;  %v1252_v23 = vmul.f32 %v2859_v12, %v3317_v48  ;;  %v1390_v43 = vpack.c.bf16 %v1331_v16, %v1329_v6  ;;  %v1290_v58 = vmul.f32 %v3451_v5, %v1247_v13 }
 0x554   :  { %1618 = vmatmul.mubr.bf16.gmra.mxu1 %v1388_v53  ;;  %v1218_v31 = vadd.f32 1e-05, %v1202_v21  ;;  %v1393_v37 = vpack.c.bf16 %v1336_v1, %v1334_v30  ;;  %v1297_v36 = vmul.f32 %v3447_v14, %v1254_v0  ;;  %v1253_v22 = vmul.f32 %v2857_v34, %v3360_v32 }
 0x555   :  { %1627 = vmatprep.mubr.bf16.mxu1 %v1391_v51  ;;  %2572 = vmatpush1.bf16.msra.mxu1 %v3424_v33  ;;  %v1292_v33 = vmul.f32 %v3451_v5, %v1249_v40  ;;  %v1217_v11 = vadd.f32 1e-05, %v1201_v60  ;;  %v1295_v4 = vmul.f32 %v3447_v14, %v1252_v23  ;;  %v1333_v41 = vadd.f32 %v3459_v19, %v1290_v58 }
 0x556   :  { %2557 = vmatprep.subr.bf16.mxu1 %v3427_v49  ;;  %2868 = vrsqrt.f32 %v1218_v31  ;;  %v1251_v54 = vmul.f32 %v2859_v12, %v3310_v45  ;;  %v1296_v32 = vmul.f32 %v3451_v5, %v1253_v22  ;;  %v2811_v22 = vld [vmem:[#allocation7 + $0x400] ss:$8 sps:$4 sm:$0xff]  }
 0x557   :  { %v2861_v49 = vpop.eup %2860  ;;  %v1335_v15 = vadd.f32 %v3459_v19, %v1292_v33  ;;  %2870 = vrsqrt.f32 %v1217_v11  ;;  %v1338_v44 = vadd.f32 %v3456_v7, %v1295_v4  ;;  %v4007_v33 = vld [vmem:[#allocation49_spill] sm:$0xff] }
 0x558   :  { %v2863_v48 = vpop.eup %2862  ;;  %v1339_v9 = vadd.f32 %v3459_v19, %v1296_v32  ;;  %v2826_v32 = vld [vmem:[#allocation7 + $0x4b0] ss:$8 sps:$4 sm:$0xff]  }
 0x559   :  { %2573 = vmatpush1.bf16.msra.mxu1 %v3430_v26  ;;  %v1340_v26 = vadd.f32 %v3456_v7, %v1297_v36  ;;  %v1256_v17 = vmul.f32 %v2863_v48, %v3333_v39  ;;  %v1392_v59 = vpack.c.bf16 %v1335_v15, %v1333_v41  ;;  %v1257_v39 = vmul.f32 %v2861_v49, %v3380_v47  ;;  %v2808_v15 = vld [vmem:[#allocation7 + $0x410] ss:$8 sps:$4 sm:$0xff]   ;;  %v2822_v41 = vld [vmem:[#allocation7 + $0x4d4] ss:$8 sps:$4 sm:$0xff]  }
 0x55a   :  { %2558 = vmatprep.subr.bf16.mxu1 %v3433_v3  ;;  %v1258_v3 = vmul.f32 %v2861_v49, %v3383_v27  ;;  %v1255_v34 = vmul.f32 %v2863_v48, %v3330_v35  ;;  %v2810_v48 = vld [vmem:[#allocation7 + $0x414] ss:$8 sps:$4 sm:$0xff]  }
 0x55b   :  { %v1299_v45 = vmul.f32 %v3447_v14, %v1256_v17  ;;  %v1300_v20 = vmul.f32 %v3451_v5, %v1257_v39  ;;  %2210 = vmatprep.subr.bf16.mxu0 %v2810_v48  ;;  %v2823_v17 = vld [vmem:[#allocation7 + $0x4c0] ss:$8 sps:$4 sm:$0xff]   ;;  %v4008_v39 = vld [vmem:[#allocation16_spill] sm:$0xff] }
 0x55c   :  { %1628 = vmatmul.mubr.bf16.gmra.mxu1 %v1390_v43  ;;  %v1301_v28 = vmul.f32 %v3447_v14, %v1258_v3  ;;  %v1298_v47 = vmul.f32 %v3451_v5, %v1255_v34  ;;  %2211 = vmatpush1.bf16.msra.mxu0 %v2808_v15  ;;  %v2817_v3 = vld [vmem:[#allocation7 + $0x4e0] ss:$8 sps:$4 sm:$0xff]  }
 0x55d   :  { %1637 = vmatprep.mubr.bf16.mxu1 %v1393_v37  ;;  %2574 = vmatpush1.bf16.msra.mxu1 %v3436_v57  ;;  %v1395_v57 = vpack.c.bf16 %v1340_v26, %v1338_v44  ;;  %v1342_v29 = vadd.f32 %v3456_v7, %v1299_v45  ;;  %v1343_v35 = vadd.f32 %v3459_v19, %v1300_v20  ;;  %v2814_v26 = vld [vmem:[#allocation7 + $0x4f0] ss:$8 sps:$4 sm:$0xff]   ;;  %v2825_v44 = vld [vmem:[#allocation7 + $0x4c4] ss:$8 sps:$4 sm:$0xff]  }
 0x55e   :  { %2559 = vmatprep.subr.bf16.mxu1 %v3439_v10  ;;  %v2865_v27 = vpop.eup %2864  ;;  %v1294_v10 = vmul.f32 %v3451_v5, %v1251_v54  ;;  %v1344_v53 = vadd.f32 %v3456_v7, %v1301_v28  ;;  %v1341_v40 = vadd.f32 %v3459_v19, %v1298_v47  ;;  %v2820_v54 = vld [vmem:[#allocation7 + $0x4d0] ss:$8 sps:$4 sm:$0xff]   ;;  %v2829_v28 = vld [vmem:[#allocation7 + $0x4a0] ss:$8 sps:$4 sm:$0xff]   ;;  %v2837_v45 = vld [vmem:[#allocation7 + $0x484] ss:$8 sps:$4 sm:$0xff]  }
 0x55f   :  { %v2867_v8 = vpop.eup %2866  ;;  %v1262_v63 = vmul.f32 %v2865_v27, %v3395_v56  ;;  %v1261_v50 = vmul.f32 %v2865_v27, %v3392_v25  ;;  %v2834_v27 = vld [vmem:[#allocation7 + $0x494] ss:$8 sps:$4 sm:$0xff]  }
 0x560   :  { %v1260_v51 = vmul.f32 %v2867_v8, %v3353_v62  ;;  %v1397_v42 = vpack.c.bf16 %v1344_v53, %v1342_v29  ;;  %v1259_v21 = vmul.f32 %v2867_v8, %v3350_v24  ;;  %v1396_v6 = vpack.c.bf16 %v1343_v35, %v1341_v40  ;;  %v2835_v8 = vld [vmem:[#allocation7 + $0x480] ss:$8 sps:$4 sm:$0xff]  }
 0x561   :  { %2575 = vmatpush1.bf16.msra.mxu1 %v3442_v2  ;;  %v1337_v2 = vadd.f32 %v3459_v19, %v1294_v10  ;;  %v1305_v12 = vmul.f32 %v3447_v14, %v1262_v63  ;;  %v1304_v13 = vmul.f32 %v3451_v5, %v1261_v50  ;;  %v2832_v10 = vld [vmem:[#allocation7 + $0x490] ss:$8 sps:$4 sm:$0xff]  }
 0x562   :  { %v1303_v56 = vmul.f32 %v3447_v14, %v1260_v51  ;;  %v1302_v25 = vmul.f32 %v3451_v5, %v1259_v21  ;;  %2560 = vmatprep.subr.bf16.mxu1 %v2810_v48  ;;  %v4009_v63 = vld [vmem:[#allocation15_spill] sm:$0xff] }
 0x563   :  { %v1394_v55 = vpack.c.bf16 %v1339_v9, %v1337_v2  ;;  %v2869_v18 = vpop.eup %2868  ;;  %v1348_v62 = vadd.f32 %v3456_v7, %v1305_v12  ;;  %v1347_v23 = vadd.f32 %v3459_v19, %v1304_v13  ;;  %v1403_v9 = vld [vmem:[#allocation8 + $0x6] ss:$8 sm:$0x3] }
 0x564   :  { %1638 = vmatmul.mubr.bf16.gmra.mxu1 %v1392_v59  ;;  %v2871_v61 = vpop.eup %2870  ;;  %v1266_v16 = vmul.f32 %v2869_v18, %v3407_v46  ;;  %v1346_v1 = vadd.f32 %v3456_v7, %v1303_v56  ;;  %v1265_v24 = vmul.f32 %v2869_v18, %v3404_v38  ;;  %v2828_v59 = vld [vmem:[#allocation7 + $0x4b4] ss:$8 sps:$4 sm:$0xff]   ;;  %v3566_v53 = vrot.slane %v1403_v9, %v4008_v39 }
 0x565   :  { %1647 = vmatprep.mubr.bf16.mxu1 %v1395_v57  ;;  %v1264_v0 = vmul.f32 %v2871_v61, %v3377_v52  ;;  %v1345_v52 = vadd.f32 %v3459_v19, %v1302_v25  ;;  %v1263_v31 = vmul.f32 %v2871_v61, %v4007_v33  ;;  %2576 = vmatpush1.bf16.msra.mxu1 %v2808_v15  ;;  %v2831_v57 = vld [vmem:[#allocation7 + $0x4a4] ss:$8 sps:$4 sm:$0xff]  }
 0x566   :  { %v1399_v60 = vpack.c.bf16 %v1348_v62, %v1346_v1  ;;  %v1309_v30 = vmul.f32 %v3447_v14, %v1266_v16  ;;  %v1308_v49 = vmul.f32 %v3451_v5, %v1265_v24  ;;  %v3569_v2 = vrot.slane %v1403_v9, %v4009_v63 }
 0x567   :  { %v1307_v46 = vmul.f32 %v3447_v14, %v1264_v0  ;;  %v1398_v36 = vpack.c.bf16 %v1347_v23, %v1345_v52  ;;  %v1306_v11 = vmul.f32 %v3451_v5, %v1263_v31  ;;  %v2816_v5 = vld [vmem:[#allocation7 + $0x4f4] ss:$8 sps:$4 sm:$0xff]  }
 0x568   :  { %v1352_v43 = vadd.f32 %v3456_v7, %v1309_v30  ;;  %v1351_v14 = vadd.f32 %v3459_v19, %v1308_v49 }
 0x569   :  { %v1350_v37 = vadd.f32 %v3456_v7, %v1307_v46  ;;  %v1349_v38 = vadd.f32 %v3459_v19, %v1306_v11  ;;  %v2813_v7 = vld [vmem:[#allocation7 + $0x404] ss:$8 sps:$4 sm:$0xff]  }
 0x56a   :  { %2212 = vmatprep.subr.bf16.mxu0 %v2813_v7  ;;  %2561 = vmatprep.subr.bf16.mxu1 %v2813_v7  ;;  %v2819_v19 = vld [vmem:[#allocation7 + $0x4e4] ss:$8 sps:$4 sm:$0xff]  }
 0x56b   :  { %v1401_v58 = vpack.c.bf16 %v1352_v43, %v1350_v37  ;;  %v1400_v4 = vpack.c.bf16 %v1351_v14, %v1349_v38  ;;  %2213 = vmatpush1.bf16.msra.mxu0 %v2811_v22  ;;  %2577 = vmatpush1.bf16.msra.mxu1 %v2811_v22 }
 0x56c   :  { %1648 = vmatmul.mubr.bf16.gmra.mxu1 %v1394_v55  ;;  %2214 = vmatprep.subr.bf16.mxu0 %v2816_v5 }
 0x56d   :  { %1657 = vmatprep.mubr.bf16.mxu1 %v1397_v42  ;;  %2562 = vmatprep.subr.bf16.mxu1 %v2816_v5 }
 0x56f   :  { %2215 = vmatpush2.bf16.msra.mxu0 %v2814_v26  ;;  %2578 = vmatpush2.bf16.msra.mxu1 %v2814_v26 }
 0x570   :  { %2216 = vmatprep.subr.bf16.mxu0 %v2819_v19  ;;  %2563 = vmatprep.subr.bf16.mxu1 %v2819_v19 }
 0x573   :  { %2217 = vmatpush2.bf16.msra.mxu0 %v2817_v3  ;;  %2579 = vmatpush2.bf16.msra.mxu1 %v2817_v3 }
 0x574   :  { %1658 = vmatmul.mubr.bf16.gmra.mxu1 %v1396_v6  ;;  %2218 = vmatprep.subr.bf16.mxu0 %v2822_v41 }
 0x575   :  { %1667 = vmatprep.mubr.bf16.mxu1 %v1399_v60  ;;  %2564 = vmatprep.subr.bf16.mxu1 %v2822_v41 }
 0x577   :  { %2219 = vmatpush2.bf16.msra.mxu0 %v2820_v54  ;;  %2580 = vmatpush2.bf16.msra.mxu1 %v2820_v54 }
 0x578   :  { %2220 = vmatprep.subr.bf16.mxu0 %v2825_v44  ;;  %2565 = vmatprep.subr.bf16.mxu1 %v2825_v44 }
 0x57b   :  { %2221 = vmatpush2.bf16.msra.mxu0 %v2823_v17  ;;  %2581 = vmatpush2.bf16.msra.mxu1 %v2823_v17 }
 0x57c   :  { %1668 = vmatmul.mubr.bf16.gmra.mxu1 %v1398_v36  ;;  %2222 = vmatprep.subr.bf16.mxu0 %v2828_v59 }
 0x57d   :  { %1677 = vmatprep.mubr.bf16.mxu1 %v1401_v58  ;;  %2566 = vmatprep.subr.bf16.mxu1 %v2828_v59 }
 0x57f   :  { %2223 = vmatpush2.bf16.msra.mxu0 %v2826_v32  ;;  %2582 = vmatpush2.bf16.msra.mxu1 %v2826_v32 }
 0x580   :  { %2224 = vmatprep.subr.bf16.mxu0 %v2831_v57  ;;  %2567 = vmatprep.subr.bf16.mxu1 %v2831_v57 }
 0x583   :  { %2225 = vmatpush2.bf16.msra.mxu0 %v2829_v28  ;;  %2583 = vmatpush2.bf16.msra.mxu1 %v2829_v28 }
 0x584   :  { %1678 = vmatmul.mubr.bf16.gmra.mxu1 %v1400_v4  ;;  %2226 = vmatprep.subr.bf16.mxu0 %v2834_v27 }
 0x585   :  { %2568 = vmatprep.subr.bf16.mxu1 %v2834_v27 }
 0x587   :  { %2227 = vmatpush2.bf16.msra.mxu0 %v2832_v10  ;;  %2584 = vmatpush2.bf16.msra.mxu1 %v2832_v10 }
 0x588   :  { %2228 = vmatprep.subr.bf16.mxu0 %v2837_v45  ;;  %2569 = vmatprep.subr.bf16.mxu1 %v2837_v45 }
 0x58b   :  { %2229 = vmatpush2.bf16.msra.mxu0 %v2835_v8  ;;  %2585 = vmatpush2.bf16.msra.mxu1 %v2835_v8 }
 0x60c   :  { %v1609_v34 = vpop.f32.mrf.mxu1 }
 0x60d   :  { %v3572_v29 = vadd.f32 %v1609_v34, %v3566_v53 }
 0x60e   :  { %v1611_v51 = vpop.f32.mrf.mxu1 }
 0x60f   :  { %v1720_v55 = vmul.f32 0.044715, %v3572_v29  ;;  %v3576_v20 = vadd.f32 %v1611_v51, %v3569_v2 }
 0x610   :  { %v1613_v42 = vpop.f32.mrf.mxu1 }
 0x611   :  { %v1752_v12 = vmul.f32 %v1720_v55, %v3572_v29  ;;  %v1721_v18 = vmul.f32 0.044715, %v3576_v20  ;;  %v3581_v47 = vadd.f32 %v1613_v42, %v3566_v53 }
 0x612   :  { %v1615_v56 = vpop.f32.mrf.mxu1 }
 0x613   :  { %v1784_v61 = vmul.f32 %v1752_v12, %v3572_v29  ;;  %v1753_v35 = vmul.f32 %v1721_v18, %v3576_v20  ;;  %v1722_v50 = vmul.f32 0.044715, %v3581_v47  ;;  %v3587_v62 = vadd.f32 %v1615_v56, %v3569_v2 }
 0x614   :  { %v1619_v16 = vpop.f32.mrf.mxu1 }
 0x615   :  { %v1816_v40 = vadd.f32 %v1784_v61, %v3572_v29  ;;  %v1785_v21 = vmul.f32 %v1753_v35, %v3576_v20  ;;  %v1754_v1 = vmul.f32 %v1722_v50, %v3581_v47  ;;  %v1723_v0 = vmul.f32 0.044715, %v3587_v62 }
 0x616   :  { %v3594_v6 = vadd.f32 %v1619_v16, %v3566_v53  ;;  %v1621_v13 = vpop.f32.mrf.mxu1 }
 0x617   :  { %v1848_v60 = vmul.f32 0.7978846, %v1816_v40  ;;  %v1786_v30 = vmul.f32 %v1754_v1, %v3581_v47  ;;  %v1755_v25 = vmul.f32 %v1723_v0, %v3587_v62  ;;  %v3599_v46 = vadd.f32 %v1621_v13, %v3569_v2 }
 0x618   :  { %v1724_v23 = vmul.f32 0.044715, %v3594_v6  ;;  %v1623_v24 = vpop.f32.mrf.mxu1  ;;  %v1817_v43 = vadd.f32 %v1785_v21, %v3576_v20 }
 0x619   :  { %v1818_v52 = vadd.f32 %v1786_v30, %v3581_v47  ;;  %v1787_v33 = vmul.f32 %v1755_v25, %v3587_v62  ;;  %v1725_v31 = vmul.f32 0.044715, %v3599_v46  ;;  %2872 = vtanh.f32 %v1848_v60 }
 0x61a   :  { %v1756_v37 = vmul.f32 %v1724_v23, %v3594_v6  ;;  %v3608_v36 = vadd.f32 %v1623_v24, %v3566_v53  ;;  %v1625_v49 = vpop.f32.mrf.mxu1  ;;  %v1849_v58 = vmul.f32 0.7978846, %v1817_v43  ;;  %v1689_v25 = vmul.f32 0.5, %v3576_v20 }
 0x61b   :  { %v1850_v11 = vmul.f32 0.7978846, %v1818_v52  ;;  %v1757_v14 = vmul.f32 %v1725_v31, %v3599_v46  ;;  %v3612_v38 = vadd.f32 %v1625_v49, %v3569_v2  ;;  %v1819_v4 = vadd.f32 %v1787_v33, %v3587_v62 }
 0x61c   :  { %v1788_v48 = vmul.f32 %v1756_v37, %v3594_v6  ;;  %v1726_v15 = vmul.f32 0.044715, %v3608_v36  ;;  %v1629_v7 = vpop.f32.mrf.mxu1  ;;  %2874 = vtanh.f32 %v1849_v58  ;;  %v1688_v23 = vmul.f32 0.5, %v3572_v29 }
 0x61d   :  { %2876 = vtanh.f32 %v1850_v11  ;;  %v1789_v22 = vmul.f32 %v1757_v14, %v3599_v46  ;;  %v1727_v5 = vmul.f32 0.044715, %v3612_v38  ;;  %v3620_v26 = vadd.f32 %v1629_v7, %v3566_v53 }
 0x61e   :  { %v1758_v19 = vmul.f32 %v1726_v15, %v3608_v36  ;;  %v1631_v3 = vpop.f32.mrf.mxu1  ;;  %v1851_v41 = vmul.f32 0.7978846, %v1819_v4  ;;  %v1820_v54 = vadd.f32 %v1788_v48, %v3594_v6  ;;  %v1691_v33 = vmul.f32 0.5, %v3587_v62 }
 0x61f   :  { %v1759_v44 = vmul.f32 %v1727_v5, %v3612_v38  ;;  %v1728_v17 = vmul.f32 0.044715, %v3620_v26  ;;  %v3627_v59 = vadd.f32 %v1631_v3, %v3569_v2  ;;  %v1821_v32 = vadd.f32 %v1789_v22, %v3599_v46 }
 0x620   :  { %v1790_v57 = vmul.f32 %v1758_v19, %v3608_v36  ;;  %v1633_v28 = vpop.f32.mrf.mxu1  ;;  %2878 = vtanh.f32 %v1851_v41  ;;  %v1852_v8 = vmul.f32 0.7978846, %v1820_v54  ;;  %v1690_v31 = vmul.f32 0.5, %v3581_v47 }
 0x621   :  { %v1791_v27 = vmul.f32 %v1759_v44, %v3612_v38  ;;  %v1729_v10 = vmul.f32 0.044715, %v3627_v59  ;;  %v3634_v45 = vadd.f32 %v1633_v28, %v3566_v53  ;;  %v1853_v34 = vmul.f32 0.7978846, %v1821_v32 }
 0x622   :  { %v1635_v9 = vpop.f32.mrf.mxu1  ;;  %v1822_v51 = vadd.f32 %v1790_v57, %v3608_v36  ;;  %v1760_v55 = vmul.f32 %v1728_v17, %v3620_v26  ;;  %v3656_v37 = vmul.f32 0.5, %v3594_v6  ;;  %v3663_v11 = vmul.f32 0.5, %v3599_v46 }
 0x623   :  { %v1761_v42 = vmul.f32 %v1729_v10, %v3627_v59  ;;  %v1730_v12 = vmul.f32 0.044715, %v3634_v45  ;;  %v3641_v18 = vadd.f32 %v1635_v9, %v3569_v2  ;;  %v1823_v61 = vadd.f32 %v1791_v27, %v3612_v38 }
 0x624   :  { %v1639_v56 = vpop.f32.mrf.mxu1  ;;  %2880 = vtanh.f32 %v1853_v34  ;;  %v1854_v35 = vmul.f32 0.7978846, %v1822_v51  ;;  %v1792_v13 = vmul.f32 %v1760_v55, %v3620_v26  ;;  %v3669_v62 = vmul.f32 0.5, %v3612_v38 }
 0x625   :  { %v1793_v50 = vmul.f32 %v1761_v42, %v3627_v59  ;;  %v1731_v16 = vmul.f32 0.044715, %v3641_v18  ;;  %2882 = vtanh.f32 %v1852_v8  ;;  %v1762_v40 = vmul.f32 %v1730_v12, %v3634_v45 }
 0x626   :  { %v1641_v21 = vpop.f32.mrf.mxu1  ;;  %v1855_v1 = vmul.f32 0.7978846, %v1823_v61  ;;  %2884 = vtanh.f32 %v1854_v35  ;;  %v2873_v0 = vpop.eup %2872  ;;  %v3666_v4 = vadd.f32 %v1639_v56, %v3566_v53  ;;  %v1694_v47 = vmul.f32 0.5, %v3608_v36 }
 0x627   :  { %v1763_v60 = vmul.f32 %v1731_v16, %v3641_v18  ;;  %v1825_v24 = vadd.f32 %v1793_v50, %v3627_v59  ;;  %v1794_v58 = vmul.f32 %v1762_v40, %v3634_v45  ;;  %v3660_v20 = vadd.f32 %v1641_v21, %v3569_v2 }
 0x628   :  { %v1643_v30 = vpop.f32.mrf.mxu1  ;;  %2886 = vtanh.f32 %v1855_v1  ;;  %v1824_v6 = vadd.f32 %v1792_v13, %v3620_v26  ;;  %v1912_v7 = vadd.f32 1.0, %v2873_v0  ;;  %v3681_v38 = vmul.f32 0.5, %v3620_v26 }
 0x629   :  { %v2875_v43 = vpop.eup %2874  ;;  %v1795_v52 = vmul.f32 %v1763_v60, %v3641_v18  ;;  %v1857_v14 = vmul.f32 0.7978846, %v1825_v24  ;;  %v1733_v36 = vmul.f32 0.044715, %v3660_v20  ;;  %v1826_v17 = vadd.f32 %v1794_v58, %v3634_v45 }
 0x62a   :  { %v2877_v49 = vpop.eup %2876  ;;  %v1645_v29 = vpop.f32.mrf.mxu1  ;;  %v1913_v15 = vadd.f32 1.0, %v2875_v43  ;;  %v1732_v32 = vmul.f32 0.044715, %v3666_v4  ;;  %v1856_v27 = vmul.f32 0.7978846, %v1824_v6  ;;  %v3688_v10 = vadd.f32 %v1643_v30, %v3566_v53 }
 0x62b   :  { %v1914_v22 = vadd.f32 1.0, %v2877_v49  ;;  %v1827_v5 = vadd.f32 %v1795_v52, %v3641_v18  ;;  %v3675_v46 = vadd.f32 %v1645_v29, %v3569_v2  ;;  %2888 = vtanh.f32 %v1857_v14 }
 0x62c   :  { %v1649_v48 = vpop.f32.mrf.mxu1  ;;  %v1945_v9 = vmul.f32 %v1913_v15, %v1689_v25  ;;  %v1944_v34 = vmul.f32 %v1912_v7, %v1688_v23  ;;  %v1765_v61 = vmul.f32 %v1733_v36, %v3660_v20  ;;  %v1858_v40 = vmul.f32 0.7978846, %v1826_v17 }
 0x62d   :  { %v2879_v19 = vpop.eup %2878  ;;  %v3678_v3 = vadd.f32 %v1649_v48, %v3566_v53  ;;  %v1859_v44 = vmul.f32 0.7978846, %v1827_v5  ;;  %v1946_v28 = vmul.f32 %v1914_v22, %v1690_v31  ;;  %v1735_v55 = vmul.f32 0.044715, %v3675_v46 }
 0x62e   :  { %v1651_v41 = vpop.f32.mrf.mxu1  ;;  %v1915_v54 = vadd.f32 1.0, %v2879_v19  ;;  %v1734_v30 = vmul.f32 0.044715, %v3688_v10  ;;  %v1764_v58 = vmul.f32 %v1732_v32, %v3666_v4  ;;  %v1797_v48 = vmul.f32 %v1765_v61, %v3660_v20 }
 0x62f   :  { %v1736_v57 = vmul.f32 0.044715, %v3678_v3  ;;  %2890 = vtanh.f32 %v1859_v44  ;;  %v3697_v35 = vadd.f32 %v1651_v41, %v3569_v2  ;;  %v2009_v60 = vpack.c.bf16 %v1946_v28, %v1944_v34 }
 0x630   :  { %v1653_v8 = vpop.f32.mrf.mxu1  ;;  %v1947_v26 = vmul.f32 %v1915_v54, %v1691_v33  ;;  %2892 = vtanh.f32 %v1856_v27  ;;  %v1767_v52 = vmul.f32 %v1735_v55, %v3675_v46  ;;  %v1766_v5 = vmul.f32 %v1734_v30, %v3688_v10 }
 0x631   :  { %v2881_v51 = vpop.eup %2880  ;;  %v1768_v42 = vmul.f32 %v1736_v57, %v3678_v3  ;;  %v3693_v12 = vadd.f32 %v1653_v8, %v3566_v53  ;;  %v1737_v29 = vmul.f32 0.044715, %v3697_v35  ;;  %2894 = vtanh.f32 %v1858_v40 }
 0x632   :  { %v2883_v56 = vpop.eup %2882  ;;  %v1655_v50 = vpop.f32.mrf.mxu1  ;;  %v2010_v16 = vpack.c.bf16 %v1947_v26, %v1945_v9  ;;  %v1917_v23 = vadd.f32 1.0, %v2881_v51  ;;  %v1799_v44 = vmul.f32 %v1767_v52, %v3675_v46  ;;  %v1697_v57 = vmul.f32 0.5, %v3627_v59 }
 0x633   :  { %v2885_v21 = vpop.eup %2884  ;;  %v1800_v1 = vmul.f32 %v1768_v42, %v3678_v3  ;;  %v1738_v0 = vmul.f32 0.044715, %v3693_v12  ;;  %v3702_v13 = vadd.f32 %v1655_v50, %v3569_v2  ;;  %v1916_v49 = vadd.f32 1.0, %v2883_v56 }
 0x634   :  { %2230 = vmatprep.mubr.bf16.mxu0 %v2010_v16  ;;  %v1659_v25 = vpop.f32.mrf.mxu1  ;;  %v1918_v24 = vadd.f32 1.0, %v2885_v21  ;;  %v1949_v41 = vmul.f32 %v1917_v23, %v3663_v11  ;;  %v1699_v9 = vmul.f32 0.5, %v3641_v18  ;;  %v1698_v26 = vmul.f32 0.5, %v3634_v45 }
 0x635   :  { %v2887_v43 = vpop.eup %2886  ;;  %v1770_v33 = vmul.f32 %v1738_v0, %v3693_v12  ;;  %v3708_v31 = vadd.f32 %v1659_v25, %v3566_v53  ;;  %2231 = vmatmul.mubr.bf16.vlgmr.msra.gmra.mxu0 %v2009_v60  ;;  %v1832_v15 = vadd.f32 %v1800_v1, %v3678_v3  ;;  %v1739_v7 = vmul.f32 0.044715, %v3702_v13 }
 0x636   :  { %v1661_v14 = vpop.f32.mrf.mxu1  ;;  %v1919_v6 = vadd.f32 1.0, %v2887_v43  ;;  %v1950_v22 = vmul.f32 %v1918_v24, %v1694_v47  ;;  %v1948_v32 = vmul.f32 %v1916_v49, %v3656_v37  ;;  %v1769_v47 = vmul.f32 %v1737_v29, %v3697_v35 }
 0x637   :  { %v1802_v19 = vmul.f32 %v1770_v33, %v3693_v12  ;;  %v1740_v17 = vmul.f32 0.044715, %v3708_v31  ;;  %v1864_v11 = vmul.f32 0.7978846, %v1832_v15  ;;  %v3728_v34 = vadd.f32 %v1661_v14, %v3569_v2 }
 0x638   :  { %v1663_v36 = vpop.f32.mrf.mxu1  ;;  %v1951_v54 = vmul.f32 %v1919_v6, %v3669_v62  ;;  %v2889_v28 = vpop.eup %2888  ;;  %v1771_v62 = vmul.f32 %v1739_v7, %v3702_v13  ;;  %v2011_v51 = vpack.c.bf16 %v1950_v22, %v1948_v32  ;;  %v1796_v37 = vmul.f32 %v1764_v58, %v3666_v4 }
 0x639   :  { %v1798_v59 = vmul.f32 %v1766_v5, %v3688_v10  ;;  %v1834_v55 = vadd.f32 %v1802_v19, %v3693_v12  ;;  %v1829_v56 = vadd.f32 %v1797_v48, %v3660_v20  ;;  %v1772_v18 = vmul.f32 %v1740_v17, %v3708_v31 }
 0x63a   :  { %v1665_v27 = vpop.f32.mrf.mxu1  ;;  %v2012_v8 = vpack.c.bf16 %v1951_v54, %v1949_v41  ;;  %v1921_v61 = vadd.f32 1.0, %v2889_v28  ;;  %v1831_v50 = vadd.f32 %v1799_v44, %v3675_v46  ;;  %v1801_v40 = vmul.f32 %v1769_v47, %v3697_v35 }
 0x63b   :  { %v3736_v45 = vadd.f32 %v1665_v27, %v3569_v2  ;;  %v3741_v21 = vmul.f32 0.5, %v3693_v12  ;;  %v3744_v0 = vmul.f32 0.5, %v3660_v20  ;;  %v1861_v60 = vmul.f32 0.7978846, %v1829_v56 }
 0x63c   :  { %2240 = vmatprep.mubr.bf16.mxu0 %v2012_v8  ;;  %v1669_v42 = vpop.f32.mrf.mxu1  ;;  %v2891_v16 = vpop.eup %2890  ;;  %2896 = vtanh.f32 %v1864_v11  ;;  %v1803_v30 = vmul.f32 %v1771_v62, %v3702_v13  ;;  %v1741_v25 = vmul.f32 0.044715, %v3728_v34  ;;  %v1866_v24 = vmul.f32 0.7978846, %v1834_v55 }
 0x63d   :  { %2241 = vmatmul.mubr.bf16.gmra.mxu0 %v2011_v51  ;;  %v1923_v23 = vadd.f32 1.0, %v2891_v16  ;;  %v3749_v43 = vadd.f32 %v1663_v36, %v3566_v53  ;;  %v1863_v33 = vmul.f32 0.7978846, %v1831_v50  ;;  %2898 = vtanh.f32 %v1861_v60  ;;  %v2893_v12 = vpop.eup %2892 }
 0x63e   :  { %v1671_v1 = vpop.f32.mrf.mxu1  ;;  %v3752_v49 = vmul.f32 %v1772_v18, %v3708_v31  ;;  %v1743_v20 = vmul.f32 0.044715, %v3736_v45  ;;  %v1953_v29 = vmul.f32 %v1921_v61, %v1697_v57  ;;  %v1920_v48 = vadd.f32 1.0, %v2893_v12  ;;  %v2895_v7 = vpop.eup %2894 }
 0x63f   :  { %v3756_v58 = vadd.f32 %v1671_v1, %v3569_v2  ;;  %v1955_v6 = vmul.f32 %v1923_v23, %v1699_v9  ;;  %2900 = vtanh.f32 %v1863_v33  ;;  %v1828_v15 = vadd.f32 %v1796_v37, %v3666_v4 }
 0x640   :  { %v1673_v52 = vpop.f32.mrf.mxu1  ;;  %v3760_v22 = vadd.f32 %v1669_v42, %v3566_v53  ;;  %v3769_v36 = vmul.f32 0.5, %v3675_v46  ;;  %v1773_v41 = vmul.f32 %v1741_v25, %v3728_v34  ;;  %v1922_v17 = vadd.f32 1.0, %v2895_v7 }
 0x641   :  { %v3763_v5 = vadd.f32 %v1673_v52, %v3566_v53  ;;  %v2014_v54 = vpack.c.bf16 %v1955_v6, %v1953_v29  ;;  %v1830_v32 = vadd.f32 %v1798_v59, %v3688_v10  ;;  %2902 = vtanh.f32 %v1866_v24 }
 0x642   :  { %v1675_v14 = vpop.f32.mrf.mxu1  ;;  %v1742_v57 = vmul.f32 0.044715, %v3749_v43  ;;  %v1775_v28 = vmul.f32 %v1743_v20, %v3736_v45  ;;  %v1745_v47 = vmul.f32 0.044715, %v3756_v58  ;;  %v1952_v27 = vmul.f32 %v1920_v48, %v3681_v38 }
 0x643   :  { %v3766_v19 = vadd.f32 %v1675_v14, %v3569_v2  ;;  %2250 = vmatprep.mubr.bf16.mxu0 %v2014_v54  ;;  %v1954_v8 = vmul.f32 %v1922_v17, %v1698_v26  ;;  %v1860_v9 = vmul.f32 0.7978846, %v1828_v15  ;;  %v1862_v11 = vmul.f32 0.7978846, %v1830_v32 }
 0x644   :  { %v1679_v44 = vpop.f32.mrf.mxu1  ;;  %v1744_v62 = vmul.f32 0.044715, %v3760_v22  ;;  %v1746_v51 = vmul.f32 0.044715, %v3763_v5  ;;  %v1833_v38 = vadd.f32 %v1801_v40, %v3697_v35  ;;  %v1805_v26 = vmul.f32 %v1773_v41, %v3728_v34 }
 0x645   :  { %v1747_v37 = vmul.f32 0.044715, %v3766_v19  ;;  %v3784_v55 = vadd.f32 %v1679_v44, %v3566_v53  ;;  %v2013_v42 = vpack.c.bf16 %v1954_v8, %v1952_v27  ;;  %2904 = vtanh.f32 %v1860_v9 }
 0x646   :  { %v1681_v46 = vpop.f32.mrf.mxu1  ;;  %v1774_v18 = vmul.f32 %v1742_v57, %v3749_v43  ;;  %v1807_v61 = vmul.f32 %v1775_v28, %v3736_v45  ;;  %v1777_v16 = vmul.f32 %v1745_v47, %v3756_v58  ;;  %2906 = vtanh.f32 %v1862_v11 }
 0x647   :  { %v3781_v59 = vadd.f32 %v1681_v46, %v3569_v2  ;;  %2251 = vmatmul.mubr.bf16.gmra.mxu0 %v2013_v42  ;;  %v1835_v60 = vadd.f32 %v1803_v30, %v3702_v13  ;;  %v1865_v25 = vmul.f32 0.7978846, %v1833_v38  ;;  %v1776_v23 = vmul.f32 %v1744_v62, %v3760_v22 }
 0x648   :  { %v1683_v56 = vpop.f32.mrf.mxu1  ;;  %v1779_v40 = vmul.f32 %v1747_v37, %v3766_v19  ;;  %v1778_v12 = vmul.f32 %v1746_v51, %v3763_v5  ;;  %v1748_v20 = vmul.f32 0.044715, %v3784_v55  ;;  %v1806_v14 = vmul.f32 %v1774_v18, %v3749_v43 }
 0x649   :  { %v1749_v50 = vmul.f32 0.044715, %v3781_v59  ;;  %v3796_v24 = vadd.f32 %v1683_v56, %v3566_v53  ;;  %v3801_v33 = vpop.eup %2896  ;;  %v1867_v29 = vmul.f32 0.7978846, %v1835_v60  ;;  %2908 = vtanh.f32 %v1865_v25 }
 0x64a   :  { %v1685_v1 = vpop.f32.mrf.mxu1  ;;  %v2899_v30 = vpop.eup %2898  ;;  %v1700_v53 = vmul.f32 0.5, %v3666_v4  ;;  %v1702_v7 = vmul.f32 0.5, %v3688_v10  ;;  %v1811_v54 = vmul.f32 %v1779_v40, %v3766_v19  ;;  %v1837_v17 = vadd.f32 %v1805_v26, %v3728_v34 }
 0x64b   :  { %v3799_v52 = vadd.f32 %v1685_v1, %v3569_v2  ;;  %v1781_v6 = vmul.f32 %v1749_v50, %v3781_v59  ;;  %v1809_v2 = vmul.f32 %v1777_v16, %v3756_v58  ;;  %v1925_v15 = vadd.f32 1.0, %v2899_v30 }
 0x64c   :  { %2910 = vtanh.f32 %v1867_v29  ;;  %v2901_v41 = vpop.eup %2900  ;;  %v1750_v44 = vmul.f32 0.044715, %v3796_v24  ;;  %v1839_v32 = vadd.f32 %v1807_v61, %v3736_v45  ;;  %v1808_v57 = vmul.f32 %v1776_v23, %v3760_v22 }
 0x64d   :  { %v1751_v48 = vmul.f32 0.044715, %v3799_v52  ;;  %v1810_v28 = vmul.f32 %v1778_v12, %v3763_v5  ;;  %v1780_v4 = vmul.f32 %v1748_v20, %v3784_v55  ;;  %v1927_v47 = vadd.f32 1.0, %v2901_v41 }
 0x64e   :  { %v1813_v27 = vmul.f32 %v1781_v6, %v3781_v59  ;;  %v1869_v8 = vmul.f32 0.7978846, %v1837_v17  ;;  %v1871_v46 = vmul.f32 0.7978846, %v1839_v32  ;;  %v2903_v9 = vpop.eup %2902  ;;  %v1957_v11 = vmul.f32 %v1925_v15, %v3744_v0 }
 0x64f   :  { %v1783_v10 = vmul.f32 %v1751_v48, %v3799_v52  ;;  %v1959_v62 = vmul.f32 %v1927_v47, %v3769_v36  ;;  %v1836_v51 = vadd.f32 %v3752_v49, %v3708_v31  ;;  %v1838_v37 = vadd.f32 %v1806_v14, %v3749_v43 }
 0x650   :  { %v1782_v42 = vmul.f32 %v1750_v44, %v3796_v24  ;;  %2912 = vtanh.f32 %v1869_v8  ;;  %v1841_v56 = vadd.f32 %v1809_v2, %v3756_v58  ;;  %v1843_v38 = vadd.f32 %v1811_v54, %v3766_v19 }
 0x651   :  { %v2016_v26 = vpack.c.bf16 %v1959_v62, %v1957_v11  ;;  %2914 = vtanh.f32 %v1871_v46  ;;  %v1868_v18 = vmul.f32 0.7978846, %v1836_v51  ;;  %v1870_v61 = vmul.f32 0.7978846, %v1838_v37 }
 0x652   :  { %v2905_v50 = vpop.eup %2904  ;;  %v1815_v0 = vmul.f32 %v1783_v10, %v3799_v52  ;;  %v1705_v36 = vmul.f32 0.5, %v3697_v35  ;;  %v1873_v16 = vmul.f32 0.7978846, %v1841_v56  ;;  %v1875_v49 = vmul.f32 0.7978846, %v1843_v38 }
 0x653   :  { %2260 = vmatprep.mubr.bf16.mxu0 %v2016_v26  ;;  %v1924_v1 = vadd.f32 1.0, %v2905_v50  ;;  %2916 = vtanh.f32 %v1868_v18  ;;  %v1840_v60 = vadd.f32 %v1808_v57, %v3760_v22  ;;  %v1842_v25 = vadd.f32 %v1810_v28, %v3763_v5  ;;  %v2907_v23 = vpop.eup %2906 }
 0x654   :  { %v1812_v40 = vmul.f32 %v1780_v4, %v3784_v55  ;;  %v1930_v12 = vadd.f32 1.0, %v2903_v9  ;;  %2918 = vtanh.f32 %v1870_v61  ;;  %v1845_v20 = vadd.f32 %v1813_v27, %v3781_v59 }
 0x655   :  { %v1814_v29 = vmul.f32 %v1782_v42, %v3796_v24  ;;  %v1926_v30 = vadd.f32 1.0, %v2907_v23  ;;  %2920 = vtanh.f32 %v1873_v16  ;;  %v1872_v35 = vmul.f32 0.7978846, %v1840_v60 }
 0x656   :  { %v2909_v14 = vpop.eup %2908  ;;  %2922 = vtanh.f32 %v1875_v49  ;;  %v1874_v6 = vmul.f32 0.7978846, %v1842_v25  ;;  %v1847_v48 = vadd.f32 %v1815_v0, %v3799_v52  ;;  %v1877_v2 = vmul.f32 0.7978846, %v1845_v20 }
 0x657   :  { %v1956_v15 = vmul.f32 %v1924_v1, %v1700_v53  ;;  %v1958_v41 = vmul.f32 %v1926_v30, %v1702_v7  ;;  %v1929_v54 = vadd.f32 1.0, %v2909_v14  ;;  %2924 = vtanh.f32 %v1872_v35 }
 0x658   :  { %v1928_v17 = vadd.f32 1.0, %v3801_v33  ;;  %2926 = vtanh.f32 %v1874_v6  ;;  %v1879_v32 = vmul.f32 0.7978846, %v1847_v48  ;;  %v1844_v57 = vadd.f32 %v1812_v40, %v3784_v55 }
 0x659   :  { %v2911_v44 = vpop.eup %2910  ;;  %v2015_v28 = vpack.c.bf16 %v1958_v41, %v1956_v15  ;;  %v1707_v4 = vmul.f32 0.5, %v3702_v13  ;;  %2928 = vtanh.f32 %v1877_v2  ;;  %v1704_v27 = vmul.f32 0.5, %v3678_v3 }
 0x65a   :  { %v1931_v47 = vadd.f32 1.0, %v2911_v44  ;;  %v1962_v10 = vmul.f32 %v1930_v12, %v3741_v21  ;;  %2930 = vtanh.f32 %v1879_v32  ;;  %v1846_v53 = vadd.f32 %v1814_v29, %v3796_v24 }
 0x65b   :  { %2261 = vmatmul.mubr.bf16.gmra.mxu0 %v2015_v28  ;;  %v1961_v7 = vmul.f32 %v1929_v54, %v1705_v36  ;;  %v1960_v33 = vmul.f32 %v1928_v17, %v1704_v27  ;;  %v1876_v46 = vmul.f32 0.7978846, %v1844_v57  ;;  %v1709_v3 = vmul.f32 0.5, %v3728_v34 }
 0x65c   :  { %v1963_v8 = vmul.f32 %v1931_v47, %v1707_v4  ;;  %v1878_v9 = vmul.f32 0.7978846, %v1846_v53  ;;  %v1711_v21 = vmul.f32 0.5, %v3736_v45  ;;  %v1708_v0 = vmul.f32 0.5, %v3708_v31 }
 0x65d   :  { %v2913_v11 = vpop.eup %2912  ;;  %v2017_v37 = vpack.c.bf16 %v1962_v10, %v1960_v33  ;;  %v1710_v36 = vmul.f32 0.5, %v3749_v43  ;;  %v1713_v34 = vmul.f32 0.5, %v3756_v58  ;;  %v1715_v40 = vmul.f32 0.5, %v3766_v19 }
 0x65e   :  { %v2018_v62 = vpack.c.bf16 %v1963_v8, %v1961_v7  ;;  %v2915_v51 = vpop.eup %2914  ;;  %v1933_v13 = vadd.f32 1.0, %v2913_v11  ;;  %2932 = vtanh.f32 %v1878_v9  ;;  %v1714_v6 = vmul.f32 0.5, %v3763_v5 }
 0x65f   :  { %v1935_v42 = vadd.f32 1.0, %v2915_v51  ;;  %2934 = vtanh.f32 %v1876_v46  ;;  %v1719_v15 = vmul.f32 0.5, %v3799_v52  ;;  %v1717_v19 = vmul.f32 0.5, %v3781_v59 }
 0x660   :  { %2270 = vmatprep.mubr.bf16.mxu1 %v2018_v62  ;;  %v2917_v56 = vpop.eup %2916  ;;  %v1965_v26 = vmul.f32 %v1933_v13, %v1709_v3  ;;  %v1712_v54 = vmul.f32 0.5, %v3760_v22  ;;  %v1718_v10 = vmul.f32 0.5, %v3796_v24  ;;  %v1716_v52 = vmul.f32 0.5, %v3784_v55  ;;  %v2026_v22 = vld [vmem:[#allocation8 + $0x7] ss:$8 sm:$0x3] }
 0x661   :  { %2271 = vmatmul.mubr.bf16.vlgmr.msra.gmra.mxu1 %v2017_v37  ;;  %v2919_v38 = vpop.eup %2918  ;;  %v1967_v18 = vmul.f32 %v1935_v42, %v1711_v21  ;;  %v1932_v61 = vadd.f32 1.0, %v2917_v56  ;;  %v3855_v33 = vrot.slane %v2026_v22, %v4008_v39  ;;  %v3858_v46 = vrot.slane %v2026_v22, %v4009_v63  ;;  %v4010_v24 = vld [vmem:[#allocation19_spill] sm:$0xff]  ;;  %v4011_v13 = vld [vmem:[#allocation20_spill] sm:$0xff] }
 0x662   :  { %v2921_v50 = vpop.eup %2920  ;;  %v1934_v16 = vadd.f32 1.0, %v2919_v38  ;;  %v4012_v39 = vld [vmem:[#allocation23_spill] sm:$0xff] }
 0x663   :  { %v2923_v49 = vpop.eup %2922  ;;  %v2020_v1 = vpack.c.bf16 %v1967_v18, %v1965_v26  ;;  %v1937_v60 = vadd.f32 1.0, %v2921_v50  ;;  %v1964_v25 = vmul.f32 %v1932_v61, %v1708_v0  ;;  %v4013_v26 = vld [vmem:[#allocation24_spill] sm:$0xff]  ;;  %v4014_v0 = vld [vmem:[#allocation17_spill] sm:$0xff]  ;;  %v4024_v22 = vld [vmem:[#allocation35_spill] sm:$0xff] }
 0x664   :  { %v2925_v45 = vpop.eup %2924  ;;  %v1966_v23 = vmul.f32 %v1934_v16, %v1710_v36  ;;  %v1939_v12 = vadd.f32 1.0, %v2923_v49 }
 0x665   :  { %v2927_v20 = vpop.eup %2926  ;;  %2280 = vmatprep.mubr.bf16.mxu1 %v2020_v1  ;;  %v1969_v35 = vmul.f32 %v1937_v60, %v1713_v34  ;;  %v1936_v2 = vadd.f32 1.0, %v2925_v45  ;;  %v4015_v1 = vld [vmem:[#allocation18_spill] sm:$0xff] }
 0x666   :  { %v2929_v29 = vpop.eup %2928  ;;  %v2019_v30 = vpack.c.bf16 %v1966_v23, %v1964_v25  ;;  %v1971_v31 = vmul.f32 %v1939_v12, %v1715_v40  ;;  %v1938_v14 = vadd.f32 1.0, %v2927_v20  ;;  %v4016_v25 = vld [vmem:[#allocation27_spill] sm:$0xff]  ;;  %v4017_v12 = vld [vmem:[#allocation28_spill] sm:$0xff] }
 0x667   :  { %v2931_v43 = vpop.eup %2930  ;;  %v1941_v48 = vadd.f32 1.0, %v2929_v29  ;;  %v1968_v28 = vmul.f32 %v1936_v2, %v1712_v54 }
 0x668   :  { %v2022_v58 = vpack.c.bf16 %v1971_v31, %v1969_v35  ;;  %v1943_v41 = vadd.f32 1.0, %v2931_v43  ;;  %v1970_v44 = vmul.f32 %v1938_v14, %v1714_v6  ;;  %v4018_v31 = vld [vmem:[#allocation21_spill] sm:$0xff] }
 0x669   :  { %2281 = vmatmul.mubr.bf16.gmra.mxu1 %v2019_v30  ;;  %v1973_v57 = vmul.f32 %v1941_v48, %v1717_v19  ;;  %v4019_v48 = vld [vmem:[#allocation22_spill] sm:$0xff] }
 0x66a   :  { %2290 = vmatprep.mubr.bf16.mxu1 %v2022_v58  ;;  %v1975_v17 = vmul.f32 %v1943_v41, %v1719_v15  ;;  %v2021_v5 = vpack.c.bf16 %v1970_v44, %v1968_v28  ;;  %v4020_v41 = vld [vmem:[#allocation31_spill] sm:$0xff]  ;;  %v4021_v44 = vld [vmem:[#allocation32_spill] sm:$0xff] }
 0x66b   :  { %v2933_v32 = vpop.eup %2932 }
 0x66c   :  { %v2935_v4 = vpop.eup %2934  ;;  %v2024_v47 = vpack.c.bf16 %v1975_v17, %v1973_v57  ;;  %v1942_v27 = vadd.f32 1.0, %v2933_v32 }
 0x66d   :  { %v1940_v53 = vadd.f32 1.0, %v2935_v4  ;;  %v4022_v4 = vld [vmem:[#allocation25_spill] sm:$0xff] }
 0x66e   :  { %v1974_v59 = vmul.f32 %v1942_v27, %v1718_v10  ;;  %v4023_v10 = vld [vmem:[#allocation26_spill] sm:$0xff] }
 0x66f   :  { %v1972_v7 = vmul.f32 %v1940_v53, %v1716_v52 }
 0x671   :  { %2291 = vmatmul.mubr.bf16.gmra.mxu1 %v2021_v5  ;;  %v2023_v8 = vpack.c.bf16 %v1974_v59, %v1972_v7 }
 0x672   :  { %2300 = vmatprep.mubr.bf16.mxu1 %v2024_v47 }
 0x679   :  { %2301 = vmatmul.mubr.bf16.gmra.mxu1 %v2023_v8 }
 0x6f5   :  { %v2232_v9 = vpop.f32.mrf.mxu0 }
 0x6f6   :  { %v2233_v11 = vadd.f32 %v2232_v9, %v3855_v33 }
 0x6f7   :  { %v2234_v62 = vpop.f32.mrf.mxu0 }
 0x6f8   :  { %v2311_v51 = vadd.f32 %v2233_v11, %v4010_v24  ;;  %v2235_v37 = vadd.f32 %v2234_v62, %v3858_v46  ;;  %v4025_v24 = vld [vmem:[#allocation29_spill] sm:$0xff] }
 0x6f9   :  { %v2236_v55 = vpop.f32.mrf.mxu0 }
 0x6fa   :  { %2343 = vst [vmem:[#allocation10] sm:$0xff] %v2311_v51  ;;  %v2312_v3 = vadd.f32 %v2235_v37, %v4011_v13  ;;  %v2237_v21 = vadd.f32 %v2236_v55, %v3855_v33  ;;  %v4026_v55 = vld [vmem:[#allocation36_spill] sm:$0xff] }
 0x6fb   :  { %v2238_v42 = vpop.f32.mrf.mxu0 }
 0x6fc   :  { %2344 = vst [vmem:[#allocation10 + $0x8] sm:$0xff] %v2312_v3  ;;  %v2313_v56 = vadd.f32 %v2237_v21, %v4012_v39  ;;  %v2239_v63 = vadd.f32 %v2238_v42, %v3858_v46  ;;  %v4027_v21 = vld [vmem:[#allocation30_spill] sm:$0xff] }
 0x6fd   :  { %v2242_v38 = vpop.f32.mrf.mxu0 }
 0x6fe   :  { %2345 = vst [vmem:[#allocation10 + $0x10] sm:$0xff] %v2313_v56  ;;  %v2314_v18 = vadd.f32 %v2239_v63, %v4013_v26  ;;  %v2243_v61 = vadd.f32 %v2242_v38, %v3855_v33  ;;  %v4028_v63 = vld [vmem:[#allocation39_spill] sm:$0xff] }
 0x6ff   :  { %v2244_v50 = vpop.f32.mrf.mxu0 }
 0x700   :  { %2346 = vst [vmem:[#allocation10 + $0x18] sm:$0xff] %v2314_v18  ;;  %v2315_v36 = vadd.f32 %v2243_v61, %v4014_v0  ;;  %v2245_v16 = vadd.f32 %v2244_v50, %v3858_v46  ;;  %v4029_v61 = vld [vmem:[#allocation40_spill] sm:$0xff] }
 0x701   :  { %v2246_v49 = vpop.f32.mrf.mxu0 }
 0x702   :  { %2347 = vst [vmem:[#allocation10 + $0x20] sm:$0xff] %v2315_v36  ;;  %v2316_v34 = vadd.f32 %v2245_v16, %v4015_v1  ;;  %v2247_v60 = vadd.f32 %v2246_v49, %v3855_v33  ;;  %v4030_v16 = vld [vmem:[#allocation33_spill] sm:$0xff] }
 0x703   :  { %v2248_v45 = vpop.f32.mrf.mxu0 }
 0x704   :  { %2348 = vst [vmem:[#allocation10 + $0x28] sm:$0xff] %v2316_v34  ;;  %v2317_v23 = vadd.f32 %v2247_v60, %v4016_v25  ;;  %v2249_v40 = vadd.f32 %v2248_v45, %v3858_v46  ;;  %v4031_v60 = vld [vmem:[#allocation34_spill] sm:$0xff] }
 0x706   :  { %2349 = vst [vmem:[#allocation10 + $0x30] sm:$0xff] %v2317_v23  ;;  %v2318_v20 = vadd.f32 %v2249_v40, %v4017_v12  ;;  %v4032_v40 = vld [vmem:[#allocation43_spill] sm:$0xff] }
 0x707   :  { %v2252_v29 = vpop.f32.mrf.mxu0 }
 0x708   :  { %2350 = vst [vmem:[#allocation10 + $0x38] sm:$0xff] %v2318_v20  ;;  %v2253_v30 = vadd.f32 %v2252_v29, %v3855_v33 }
 0x709   :  { %v2254_v35 = vpop.f32.mrf.mxu0 }
 0x70a   :  { %v2319_v14 = vadd.f32 %v2253_v30, %v4018_v31  ;;  %v2255_v43 = vadd.f32 %v2254_v35, %v3858_v46  ;;  %v4033_v30 = vld [vmem:[#allocation44_spill] sm:$0xff] }
 0x70b   :  { %v2256_v6 = vpop.f32.mrf.mxu0 }
 0x70c   :  { %2351 = vst [vmem:[#allocation10 + $0x40] sm:$0xff] %v2319_v14  ;;  %v2320_v58 = vadd.f32 %v2255_v43, %v4019_v48  ;;  %v2257_v2 = vadd.f32 %v2256_v6, %v3855_v33  ;;  %v4034_v43 = vld [vmem:[#allocation37_spill] sm:$0xff] }
 0x70d   :  { %v2258_v15 = vpop.f32.mrf.mxu0 }
 0x70e   :  { %2352 = vst [vmem:[#allocation10 + $0x48] sm:$0xff] %v2320_v58  ;;  %v2321_v19 = vadd.f32 %v2257_v2, %v4020_v41  ;;  %v2259_v54 = vadd.f32 %v2258_v15, %v3858_v46  ;;  %v4035_v2 = vld [vmem:[#allocation38_spill] sm:$0xff] }
 0x710   :  { %2353 = vst [vmem:[#allocation10 + $0x50] sm:$0xff] %v2321_v19  ;;  %v2322_v17 = vadd.f32 %v2259_v54, %v4021_v44  ;;  %v4036_v54 = vld [vmem:[#allocation45_spill] sm:$0xff] }
 0x712   :  { %2354 = vst [vmem:[#allocation10 + $0x58] sm:$0xff] %v2322_v17 }
 0x71b   :  { %v2262_v32 = vpop.f32.mrf.mxu0 }
 0x71c   :  { %v2263_v57 = vadd.f32 %v2262_v32, %v3855_v33 }
 0x71d   :  { %v2264_v28 = vpop.f32.mrf.mxu0 }
 0x71e   :  { %v2323_v47 = vadd.f32 %v2263_v57, %v4022_v4  ;;  %v2265_v5 = vadd.f32 %v2264_v28, %v3858_v46  ;;  %v4037_v57 = vld [vmem:[#allocation46_spill] sm:$0xff] }
 0x71f   :  { %v2266_v27 = vpop.f32.mrf.mxu0 }
 0x720   :  { %2355 = vst [vmem:[#allocation10 + $0x60] sm:$0xff] %v2323_v47  ;;  %v2324_v53 = vadd.f32 %v2265_v5, %v4023_v10  ;;  %v2267_v52 = vadd.f32 %v2266_v27, %v3855_v33  ;;  %v4038_v5 = vld [vmem:[#allocation41_spill] sm:$0xff] }
 0x721   :  { %v2272_v59 = vpop.f32.mrf.mxu1  ;;  %v2268_v7 = vpop.f32.mrf.mxu0 }
 0x722   :  { %v2273_v8 = vadd.f32 %v2272_v59, %v3855_v33  ;;  %2356 = vst [vmem:[#allocation10 + $0x68] sm:$0xff] %v2324_v53  ;;  %v2325_v9 = vadd.f32 %v2267_v52, %v4024_v22  ;;  %v2269_v11 = vadd.f32 %v2268_v7, %v3858_v46  ;;  %v4039_v52 = vld [vmem:[#allocation42_spill] sm:$0xff]  ;;  %v4040_v22 = vld [vmem:[#allocation47_spill] sm:$0xff] }
 0x723   :  { %v2274_v62 = vpop.f32.mrf.mxu1 }
 0x724   :  { %v2327_v51 = vadd.f32 %v2273_v8, %v4025_v24  ;;  %v2275_v37 = vadd.f32 %v2274_v62, %v3858_v46  ;;  %2357 = vst [vmem:[#allocation10 + $0x70] sm:$0xff] %v2325_v9  ;;  %v2326_v13 = vadd.f32 %v2269_v11, %v4026_v55  ;;  %v4041_v62 = vld [vmem:[#allocation48_spill] sm:$0xff] }
 0x725   :  { %v2276_v3 = vpop.f32.mrf.mxu1 }
 0x726   :  { %2359 = vst [vmem:[#allocation10 + $0x80] sm:$0xff] %v2327_v51  ;;  %v2328_v42 = vadd.f32 %v2275_v37, %v4027_v21  ;;  %v2277_v39 = vadd.f32 %v2276_v3, %v3855_v33  ;;  %2358 = vst [vmem:[#allocation10 + $0x78] sm:$0xff] %v2326_v13 }
 0x727   :  { %v2278_v56 = vpop.f32.mrf.mxu1 }
 0x728   :  { %2360 = vst [vmem:[#allocation10 + $0x88] sm:$0xff] %v2328_v42  ;;  %v2329_v38 = vadd.f32 %v2277_v39, %v4028_v63  ;;  %v2279_v26 = vadd.f32 %v2278_v56, %v3858_v46 }
 0x729   :  { %v2282_v18 = vpop.f32.mrf.mxu1 }
 0x72a   :  { %2361 = vst [vmem:[#allocation10 + $0x90] sm:$0xff] %v2329_v38  ;;  %v2330_v50 = vadd.f32 %v2279_v26, %v4029_v61  ;;  %v2283_v0 = vadd.f32 %v2282_v18, %v3855_v33 }
 0x72b   :  { %v2284_v36 = vpop.f32.mrf.mxu1 }
 0x72c   :  { %2362 = vst [vmem:[#allocation10 + $0x98] sm:$0xff] %v2330_v50  ;;  %v2331_v49 = vadd.f32 %v2283_v0, %v4030_v16  ;;  %v2285_v1 = vadd.f32 %v2284_v36, %v3858_v46 }
 0x72d   :  { %v2286_v34 = vpop.f32.mrf.mxu1 }
 0x72e   :  { %2363 = vst [vmem:[#allocation10 + $0xa0] sm:$0xff] %v2331_v49  ;;  %v2332_v45 = vadd.f32 %v2285_v1, %v4031_v60  ;;  %v2287_v25 = vadd.f32 %v2286_v34, %v3855_v33 }
 0x72f   :  { %v2288_v23 = vpop.f32.mrf.mxu1 }
 0x730   :  { %2364 = vst [vmem:[#allocation10 + $0xa8] sm:$0xff] %v2332_v45  ;;  %v2333_v12 = vadd.f32 %v2287_v25, %v4032_v40  ;;  %v2289_v20 = vadd.f32 %v2288_v23, %v3858_v46 }
 0x731   :  { %v2292_v29 = vpop.f32.mrf.mxu1 }
 0x732   :  { %2365 = vst [vmem:[#allocation10 + $0xb0] sm:$0xff] %v2333_v12  ;;  %v2334_v35 = vadd.f32 %v2289_v20, %v4033_v30  ;;  %v2293_v31 = vadd.f32 %v2292_v29, %v3855_v33 }
 0x733   :  { %v2294_v14 = vpop.f32.mrf.mxu1 }
 0x734   :  { %2366 = vst [vmem:[#allocation10 + $0xb8] sm:$0xff] %v2334_v35  ;;  %v2335_v6 = vadd.f32 %v2293_v31, %v4034_v43  ;;  %v2295_v48 = vadd.f32 %v2294_v14, %v3858_v46 }
 0x735   :  { %v2296_v58 = vpop.f32.mrf.mxu1 }
 0x736   :  { %2367 = vst [vmem:[#allocation10 + $0xc0] sm:$0xff] %v2335_v6  ;;  %v2336_v15 = vadd.f32 %v2295_v48, %v4035_v2  ;;  %v2297_v41 = vadd.f32 %v2296_v58, %v3855_v33 }
 0x737   :  { %v2298_v19 = vpop.f32.mrf.mxu1 }
 0x738   :  { %2368 = vst [vmem:[#allocation10 + $0xc8] sm:$0xff] %v2336_v15  ;;  %v2337_v44 = vadd.f32 %v2297_v41, %v4036_v54  ;;  %v2299_v17 = vadd.f32 %v2298_v19, %v3858_v46 }
 0x739   :  { %v2302_v32 = vpop.f32.mrf.mxu1 }
 0x73a   :  { %2369 = vst [vmem:[#allocation10 + $0xd0] sm:$0xff] %v2337_v44  ;;  %v2338_v28 = vadd.f32 %v2299_v17, %v4037_v57  ;;  %v2303_v4 = vadd.f32 %v2302_v32, %v3855_v33 }
 0x73b   :  { %v2304_v47 = vpop.f32.mrf.mxu1 }
 0x73c   :  { %2370 = vst [vmem:[#allocation10 + $0xd8] sm:$0xff] %v2338_v28  ;;  %v2339_v27 = vadd.f32 %v2303_v4, %v4038_v5  ;;  %v2305_v10 = vadd.f32 %v2304_v47, %v3858_v46 }
 0x73d   :  { %v2306_v53 = vpop.f32.mrf.mxu1 }
 0x73e   :  { %2371 = vst [vmem:[#allocation10 + $0xe0] sm:$0xff] %v2339_v27  ;;  %v2340_v59 = vadd.f32 %v2305_v10, %v4039_v52  ;;  %v2307_v7 = vadd.f32 %v2306_v53, %v3855_v33 }
 0x73f   :  { %v2308_v8 = vpop.f32.mrf.mxu1 }
 0x740   :  { %2372 = vst [vmem:[#allocation10 + $0xe8] sm:$0xff] %v2340_v59  ;;  %v2341_v9 = vadd.f32 %v2307_v7, %v4040_v22  ;;  %v2309_v11 = vadd.f32 %v2308_v8, %v3858_v46 }
 0x742   :  { %2373 = vst [vmem:[#allocation10 + $0xf0] sm:$0xff] %v2341_v9  ;;  %v2342_v24 = vadd.f32 %v2309_v11, %v4041_v62 }
 0x744   :  { %2374 = vst [vmem:[#allocation10 + $0xf8] sm:$0xff] %v2342_v24 }
 0x745   :  { %3027 = shalt.err (!%p3024_p10)
}
 0x746   :  { %2386 = dma.vmem_to_hbm [thread:$0]  %s2381_s3, 4096, %s3934_s4, [#allocation4], %s3048_s25, %s3048_s25, %s3049_s26  }
 0x747   :  { %3042 = dma.done.wait [#allocation4], 4096  }
 0x748   :  { %3043 = vsyncadd [#allocation4], 4294963200 }
 0x749   :  { %2390 = vsyncpa [#allocation3], 1 }
 0x74a   :  { %2391 = vsyncpa [#allocation6], 1 }
 0x74b   :  { %2392 = vsyncpa [#allocation9], 1 }
 0x74c   :  { %2393 = vsyncpa [#allocation4], 1 }

</bundles_post_ra>
